<compile_context>
chip_gen: v7x
topology: tpu7x:2x2x1
jax: 0.10.0
libtpu: 0.0.40
codegen_flags: <defaults>
</compile_context>

<pallas_src>
import jax
import jax.numpy as jnp
from jax import lax
from jax.experimental import pallas as pl
from jax.experimental.pallas import tpu as pltpu


def _round_up(x, m):
    return (x + m - 1) // m * m


# -----------------------------------------------------------------------------
# Weight fusion helpers (wrapper-side, plain JAX).
# Stream order: 0=for_U, 1=rev_U, 2=for_V, 3=rev_V.
# Fused gate layout is gate-major: columns = [r: s0 s1 s2 s3 | z: ... | n: ...].
# -----------------------------------------------------------------------------
def _fuse_block_diag(w_list, H):
    """w_list: S arrays [F_s, 3H] (gate order r,z,n). -> [sum F_s, 3*S*H]."""
    S = len(w_list)
    F_tot = sum(int(w.shape[0]) for w in w_list)
    out = jnp.zeros((F_tot, 3 * S * H), jnp.float32)
    r0 = 0
    for s, w in enumerate(w_list):
        F_s = int(w.shape[0])
        for g in range(3):
            out = out.at[r0:r0 + F_s,
                         g * S * H + s * H: g * S * H + (s + 1) * H].set(
                             w[:, g * H:(g + 1) * H])
        r0 += F_s
    return out


def _fuse_layer1_win(w_for_U, w_rev_U, w_for_V, w_rev_V, H):
    """Layer-1 input weights. Input row layout: [U-features | V-features].

    Returns (w_fwd, w_rev), each [F_U+F_V, 12H]; w_fwd feeds streams 0,2 and
    w_rev feeds streams 1,3 (other columns zero) so the reversed streams can
    read the same hoisted projection with a time-reversed index.
    """
    F_U = int(w_for_U.shape[0])
    F_V = int(w_for_V.shape[0])
    S = 4
    w_fwd = jnp.zeros((F_U + F_V, 3 * S * H), jnp.float32)
    w_rev = jnp.zeros((F_U + F_V, 3 * S * H), jnp.float32)
    for g in range(3):
        blk = slice(g * H, (g + 1) * H)
        def col(s, g=g):
            return slice(g * S * H + s * H, g * S * H + (s + 1) * H)
        w_fwd = w_fwd.at[:F_U, col(0)].set(w_for_U[:, blk])
        w_rev = w_rev.at[:F_U, col(1)].set(w_rev_U[:, blk])
        w_fwd = w_fwd.at[F_U:, col(2)].set(w_for_V[:, blk])
        w_rev = w_rev.at[F_U:, col(3)].set(w_rev_V[:, blk])
    return w_fwd, w_rev


def _fuse_biases(b_ih_list, b_hh_list, H):
    """b_in [1, 3*S*H]: r,z gates carry b_ih+b_hh, n gate carries b_ih only.
    b_hn [1, S*H]: per-stream b_hh of the n gate (applied inside r*(...))."""
    S = len(b_ih_list)
    parts = []
    for g in range(3):
        for s in range(S):
            bi = b_ih_list[s][:, g * H:(g + 1) * H]
            if g < 2:
                parts.append(bi + b_hh_list[s][:, g * H:(g + 1) * H])
            else:
                parts.append(bi)
    b_in = jnp.concatenate(parts, axis=1)
    b_hn = jnp.concatenate([b_hh_list[s][:, 2 * H:3 * H] for s in range(S)],
                           axis=1)
    return b_in, b_hn


# -----------------------------------------------------------------------------
# Fused 4-stream multi-layer GRU kernel (one grid step = one block of node rows).
# -----------------------------------------------------------------------------
def make_ddne_kernel(T, block_b, layer_H):
    num_layers = len(layer_H)
    S = 4

    def kernel(*refs):
        x_ref = refs[0]            # [T, block_b, F_U + F_V]
        out_ref = refs[-1]         # [block_b, T * 4 * H_last]
        idx = 1

        def run_layer(gi_list, whh, b_hn, SH):
            # Serial recurrence over T (fully unrolled): ONE hidden-path matmul
            # per step for all 4 streams; single sigmoid over the r,z lanes.
            b_hn_b = jnp.broadcast_to(b_hn, (block_b, SH))
            h = jnp.zeros((block_b, SH), jnp.float32)
            outs = []
            for t in range(T):
                gi = gi_list[t]                                   # [bB, 3*SH]
                gh = jnp.dot(h, whh, preferred_element_type=jnp.float32)
                rz = jax.nn.sigmoid(gi[:, :2 * SH] + gh[:, :2 * SH])
                r = rz[:, :SH]
                z = rz[:, SH:]
                n = jnp.tanh(gi[:, 2 * SH:] + r * (gh[:, 2 * SH:] + b_hn_b))
                h = (1.0 - z) * n + z * h
                outs.append(h)
            return outs

        # ---------------- layer 1 (forward/reverse share the same input) ------
        H = layer_H[0]
        SH = S * H
        w1f = refs[idx][...]
        w1r = refs[idx + 1][...]
        b_in = refs[idx + 2][...]
        b_hn = refs[idx + 3][...]
        whh = refs[idx + 4][...]
        idx += 5

        b_in_b = jnp.broadcast_to(b_in, (block_b, 3 * SH))
        p_fwd, p_rev = [], []
        for t in range(T):                      # hoisted input projections
            xt = x_ref[t]                        # [block_b, F_U + F_V]
            p_fwd.append(jnp.dot(xt, w1f,
                                 preferred_element_type=jnp.float32) + b_in_b)
            p_rev.append(jnp.dot(xt, w1r,
                                 preferred_element_type=jnp.float32))
        # reverse streams (columns of p_rev) read the time-reversed projection
        gi_list = [p_fwd[t] + p_rev[T - 1 - t] for t in range(T)]
        outs = run_layer(gi_list, whh, b_hn, SH)

        # ---------------- deeper layers ---------------------------------------
        for l in range(1, num_layers):
            H = layer_H[l]
            SH = S * H
            win = refs[idx][...]
            b_in = refs[idx + 1][...]
            b_hn = refs[idx + 2][...]
            whh = refs[idx + 3][...]
            idx += 4
            b_in_b = jnp.broadcast_to(b_in, (block_b, 3 * SH))
            gi_list = [jnp.dot(outs[t], win,
                               preferred_element_type=jnp.float32) + b_in_b
                       for t in range(T)]
            outs = run_layer(gi_list, whh, b_hn, SH)

        # Single lane-dense store: [block_b, T * 4 * H_last].
        out_ref[...] = jnp.concatenate(outs, axis=1)

    return kernel


# -----------------------------------------------------------------------------
# Wrapper: builds fused weights, node-tiled input, one pallas_call.
# -----------------------------------------------------------------------------
def ddne_enc_forward(adj, params):
    """adj: [win_size, num_U, num_V] stacked bipartite adjacency matrices."""
    T, num_U, num_V = adj.shape
    stream_names = ("for_U", "rev_U", "for_V", "rev_V")
    num_layers = len(params["for_U"])
    layer_H = [int(params["for_U"][l][1].shape[0]) for l in range(num_layers)]
    H_last = layer_H[-1]

    # Node-row padding / tiling (rows are independent GRU instances).
    Bp = _round_up(max(num_U, num_V), 8)
    if Bp > 512:
        block_b = 256
        Bp = _round_up(Bp, block_b)
    else:
        block_b = Bp
    n_blocks = Bp // block_b

    # Input: [T, Bp, num_V + num_U]; row b carries adj[t, b, :] (U streams) and
    # adj[t, :, b] (V streams).  No duplicated reversed copy.
    F_U, F_V = num_V, num_U
    F_tot = F_U + F_V
    xU = jnp.pad(adj, ((0, 0), (0, Bp - num_U), (0, 0)))
    xV = jnp.pad(jnp.transpose(adj, (0, 2, 1)), ((0, 0), (0, Bp - num_V), (0, 0)))
    x = jnp.concatenate([xU, xV], axis=2).astype(jnp.float32)

    # Fused, gate-major, block-diagonal weights.
    weight_args = []
    H1 = layer_H[0]
    w1f, w1r = _fuse_layer1_win(params["for_U"][0][0], params["rev_U"][0][0],
                                params["for_V"][0][0], params["rev_V"][0][0], H1)
    b_in1, b_hn1 = _fuse_biases([params[n][0][2] for n in stream_names],
                                [params[n][0][3] for n in stream_names], H1)
    whh1 = _fuse_block_diag([params[n][0][1] for n in stream_names], H1)
    weight_args += [w1f, w1r, b_in1, b_hn1, whh1]
    for l in range(1, num_layers):
        H = layer_H[l]
        win = _fuse_block_diag([params[n][l][0] for n in stream_names], H)
        b_in, b_hn = _fuse_biases([params[n][l][2] for n in stream_names],
                                  [params[n][l][3] for n in stream_names], H)
        whh = _fuse_block_diag([params[n][l][1] for n in stream_names], H)
        weight_args += [win, b_in, b_hn, whh]

    # Specs: x / out tiled over node rows; fused weights fully VMEM-resident
    # (constant index map -> fetched once, not re-DMA'd per grid step).
    x_spec = pl.BlockSpec((T, block_b, F_tot), lambda i: (0, i, 0))
    w_specs = [pl.BlockSpec(w.shape, lambda i: (0, 0)) for w in weight_args]
    out_cols = T * 4 * H_last
    out_spec = pl.BlockSpec((block_b, out_cols), lambda i: (i, 0))

    # Size-derived VMEM budget with headroom, capped below v7x's 64 MiB.
    max_h = max(layer_H)
    inter_bytes = 6 * T * block_b * 12 * max_h * 4
    io_bytes = 2 * (T * block_b * F_tot * 4 + block_b * out_cols * 4)
    w_bytes = sum(int(w.size) for w in weight_args) * 4
    vmem_limit = int(min(max(io_bytes + w_bytes + 2 * inter_bytes + (4 << 20),
                             8 << 20), 56 << 20))

    out = pl.pallas_call(
        make_ddne_kernel(T, block_b, layer_H),
        out_shape=jax.ShapeDtypeStruct((Bp, out_cols), jnp.float32),
        grid=(n_blocks,),
        in_specs=[x_spec] + w_specs,
        out_specs=out_spec,
        compiler_params=pltpu.CompilerParams(
            dimension_semantics=("parallel",),
            vmem_limit_bytes=vmem_limit),
    )(x, *weight_args)

    # Layout-only split: per t, lanes are [for_U | rev_U | for_V | rev_V].
    out = out.reshape(Bp, T, 4, H_last)
    dyn_emb_U = out[:num_U, :, 0:2, :].reshape(num_U, T * 2 * H_last)
    dyn_emb_V = out[:num_V, :, 2:4, :].reshape(num_V, T * 2 * H_last)
    return dyn_emb_U, dyn_emb_V


# -----------------------------------------------------------------------------
# Pure-JAX reference (independent lax.scan implementation, per-stream weights).
# -----------------------------------------------------------------------------
def _gru_layer_ref(x_seq, w_ih, w_hh, b_ih, b_hh):
    H = w_hh.shape[0]

    def step(h, x_t):
        gi = jnp.dot(x_t, w_ih, precision=lax.Precision.HIGHEST) + b_ih
        gh = jnp.dot(h, w_hh, precision=lax.Precision.HIGHEST) + b_hh
        r = jax.nn.sigmoid(gi[:, :H] + gh[:, :H])
        z = jax.nn.sigmoid(gi[:, H:2 * H] + gh[:, H:2 * H])
        n = jnp.tanh(gi[:, 2 * H:] + r * gh[:, 2 * H:])
        h_new = (1.0 - z) * n + z * h
        return h_new, h_new

    h0 = jnp.zeros((x_seq.shape[1], H), jnp.float32)
    _, ys = lax.scan(step, h0, x_seq)
    return ys


def ddne_enc_forward_ref(adj, params):
    T = adj.shape[0]
    streams = {
        "for_U": adj,
        "rev_U": adj[::-1],
        "for_V": jnp.transpose(adj, (0, 2, 1)),
        "rev_V": jnp.transpose(adj[::-1], (0, 2, 1)),
    }
    num_layers = len(params["for_U"])
    for l in range(num_layers):
        for name in streams:
            streams[name] = _gru_layer_ref(streams[name], *params[name][l])
    emb_U = jnp.concatenate(
        [jnp.concatenate([streams["for_U"][t], streams["rev_U"][t]], axis=1)
         for t in range(T)], axis=1)
    emb_V = jnp.concatenate(
        [jnp.concatenate([streams["for_V"][t], streams["rev_V"][t]], axis=1)
         for t in range(T)], axis=1)
    return emb_U, emb_V


# -----------------------------------------------------------------------------
# Parameter construction: PyTorch-style uniform(-1/sqrt(H), +1/sqrt(H)), stored
# per stream with (r,z,n) concatenated along the output dim.
# -----------------------------------------------------------------------------
def init_ddne_params(key, enc_dims, num_U, num_V):
    num_layers = len(enc_dims) - 1
    params = {"for_U": [], "rev_U": [], "for_V": [], "rev_V": []}
    in_U, in_V = num_V, num_U
    for l in range(num_layers):
        H = enc_dims[l + 1]
        k = 1.0 / float(H) ** 0.5
        for name, in_size in (("for_U", in_U), ("rev_U", in_U),
                              ("for_V", in_V), ("rev_V", in_V)):
            key, k1, k2, k3, k4 = jax.random.split(key, 5)
            w_ih = jax.random.uniform(k1, (in_size, 3 * H), jnp.float32, -k, k)
            w_hh = jax.random.uniform(k2, (H, 3 * H), jnp.float32, -k, k)
            b_ih = jax.random.uniform(k3, (1, 3 * H), jnp.float32, -k, k)
            b_hh = jax.random.uniform(k4, (1, 3 * H), jnp.float32, -k, k)
            params[name].append((w_ih, w_hh, b_ih, b_hh))
        in_U, in_V = H, H
    return params


if __name__ == "__main__":
    # Small, deterministic test configuration.
    win_size = 4            # number of historical adjacency snapshots (T)
    num_U, num_V = 8, 12    # bipartite node counts
    enc_dims = [num_V, 16, 32]   # 2 GRU encoder layers
    # TODO(synk): dropout_rate exists on the PyTorch module but is unused in its
    # forward(), so it is intentionally not applied here.

    key = jax.random.PRNGKey(0)
    key, k_adj, k_par = jax.random.split(key, 3)
    adj = (jax.random.uniform(k_adj, (win_size, num_U, num_V)) > 0.5).astype(jnp.float32)
    params = init_ddne_params(k_par, enc_dims, num_U, num_V)

    # Pallas-kernel forward.
    dyn_emb_U, dyn_emb_V = ddne_enc_forward(adj, params)
    dyn_emb_U = jax.block_until_ready(dyn_emb_U)
    dyn_emb_V = jax.block_until_ready(dyn_emb_V)

    # Shape checks (match PyTorch DDNE_Enc output shapes).
    H_last = enc_dims[-1]
    assert dyn_emb_U.shape == (num_U, win_size * 2 * H_last), dyn_emb_U.shape
    assert dyn_emb_V.shape == (num_V, win_size * 2 * H_last), dyn_emb_V.shape

    # Numerical check against an independent pure-JAX reference GRU stack.
    ref_U, ref_V = ddne_enc_forward_ref(adj, params)
    assert jnp.allclose(dyn_emb_U, ref_U, atol=1e-4, rtol=1e-4), \
        float(jnp.max(jnp.abs(dyn_emb_U - ref_U)))
    assert jnp.allclose(dyn_emb_V, ref_V, atol=1e-4, rtol=1e-4), \
        float(jnp.max(jnp.abs(dyn_emb_V - ref_V)))

    print("KERNEL_OK")
</pallas_src>

<mosaic_0001>
module attributes {stable_mosaic.version = 11 : i64} {
  func.func @kernel(%arg0: i32, %arg1: memref<4x16x20xf32, #tpu.memory_space<vmem>>, %arg2: memref<20x192xf32, #tpu.memory_space<vmem>>, %arg3: memref<20x192xf32, #tpu.memory_space<vmem>>, %arg4: memref<1x192xf32, #tpu.memory_space<vmem>>, %arg5: memref<1x64xf32, #tpu.memory_space<vmem>>, %arg6: memref<64x192xf32, #tpu.memory_space<vmem>>, %arg7: memref<64x384xf32, #tpu.memory_space<vmem>>, %arg8: memref<1x384xf32, #tpu.memory_space<vmem>>, %arg9: memref<1x128xf32, #tpu.memory_space<vmem>>, %arg10: memref<128x384xf32, #tpu.memory_space<vmem>>, %arg11: memref<16x512xf32, #tpu.memory_space<vmem>>) attributes {dimension_semantics = [#tpu.dimension_semantics<parallel>], iteration_bounds = array<i64: 1>, scalar_prefetch = 0 : i64, scratch_operands = 0 : i64, tpu.core_type = #tpu.core_type<tc>, window_params = [{transform_indices = @transform_0, window_bounds = array<i64: 4, 16, 20>}, {pipeline_mode = #tpu.pipeline_mode<synchronous>, transform_indices = @transform_1, window_bounds = array<i64: 20, 192>}, {pipeline_mode = #tpu.pipeline_mode<synchronous>, transform_indices = @transform_2, window_bounds = array<i64: 20, 192>}, {pipeline_mode = #tpu.pipeline_mode<synchronous>, transform_indices = @transform_3, window_bounds = array<i64: 1, 192>}, {pipeline_mode = #tpu.pipeline_mode<synchronous>, transform_indices = @transform_4, window_bounds = array<i64: 1, 64>}, {pipeline_mode = #tpu.pipeline_mode<synchronous>, transform_indices = @transform_5, window_bounds = array<i64: 64, 192>}, {pipeline_mode = #tpu.pipeline_mode<synchronous>, transform_indices = @transform_6, window_bounds = array<i64: 64, 384>}, {pipeline_mode = #tpu.pipeline_mode<synchronous>, transform_indices = @transform_7, window_bounds = array<i64: 1, 384>}, {pipeline_mode = #tpu.pipeline_mode<synchronous>, transform_indices = @transform_8, window_bounds = array<i64: 1, 128>}, {pipeline_mode = #tpu.pipeline_mode<synchronous>, transform_indices = @transform_9, window_bounds = array<i64: 128, 384>}, {transform_indices = @transform_10, window_bounds = array<i64: 16, 512>}]} {
    %c0 = arith.constant 0 : index
    %c0_0 = arith.constant 0 : index
    %0 = vector.load %arg2[%c0, %c0_0] : memref<20x192xf32, #tpu.memory_space<vmem>>, vector<20x192xf32>
    %c0_1 = arith.constant 0 : index
    %c0_2 = arith.constant 0 : index
    %1 = vector.load %arg3[%c0_1, %c0_2] : memref<20x192xf32, #tpu.memory_space<vmem>>, vector<20x192xf32>
    %c0_3 = arith.constant 0 : index
    %c0_4 = arith.constant 0 : index
    %2 = vector.load %arg4[%c0_3, %c0_4] : memref<1x192xf32, #tpu.memory_space<vmem>>, vector<1x192xf32>
    %c0_5 = arith.constant 0 : index
    %c0_6 = arith.constant 0 : index
    %3 = vector.load %arg5[%c0_5, %c0_6] : memref<1x64xf32, #tpu.memory_space<vmem>>, vector<1x64xf32>
    %c0_7 = arith.constant 0 : index
    %c0_8 = arith.constant 0 : index
    %4 = vector.load %arg6[%c0_7, %c0_8] : memref<64x192xf32, #tpu.memory_space<vmem>>, vector<64x192xf32>
    %5 = vector.shape_cast %2 : vector<1x192xf32> to vector<1x192xf32>
    %6 = vector.broadcast %5 : vector<1x192xf32> to vector<16x192xf32>
    %c0_9 = arith.constant 0 : index
    %c0_10 = arith.constant 0 : index
    %c0_11 = arith.constant 0 : index
    %7 = vector.load %arg1[%c0_9, %c0_10, %c0_11] : memref<4x16x20xf32, #tpu.memory_space<vmem>>, vector<1x16x20xf32>
    %8 = vector.shape_cast %7 : vector<1x16x20xf32> to vector<16x20xf32>
    %cst = arith.constant dense<0.000000e+00> : vector<16x192xf32>
    %9 = tpu.matmul %8, %0, %cst {dimension_numbers = #tpu.dot_dimension_numbers<[1], [0], [0], [1], [0, 0, 1, 1], [], []>} : vector<16x20xf32>, vector<20x192xf32>, vector<16x192xf32> -> vector<16x192xf32>
    %10 = arith.addf %9, %6 : vector<16x192xf32>
    %cst_12 = arith.constant dense<0.000000e+00> : vector<16x192xf32>
    %11 = tpu.matmul %8, %1, %cst_12 {dimension_numbers = #tpu.dot_dimension_numbers<[1], [0], [0], [1], [0, 0, 1, 1], [], []>} : vector<16x20xf32>, vector<20x192xf32>, vector<16x192xf32> -> vector<16x192xf32>
    %c1 = arith.constant 1 : index
    %c0_13 = arith.constant 0 : index
    %c0_14 = arith.constant 0 : index
    %12 = vector.load %arg1[%c1, %c0_13, %c0_14] : memref<4x16x20xf32, #tpu.memory_space<vmem>>, vector<1x16x20xf32>
    %13 = vector.shape_cast %12 : vector<1x16x20xf32> to vector<16x20xf32>
    %cst_15 = arith.constant dense<0.000000e+00> : vector<16x192xf32>
    %14 = tpu.matmul %13, %0, %cst_15 {dimension_numbers = #tpu.dot_dimension_numbers<[1], [0], [0], [1], [0, 0, 1, 1], [], []>} : vector<16x20xf32>, vector<20x192xf32>, vector<16x192xf32> -> vector<16x192xf32>
    %15 = arith.addf %14, %6 : vector<16x192xf32>
    %cst_16 = arith.constant dense<0.000000e+00> : vector<16x192xf32>
    %16 = tpu.matmul %13, %1, %cst_16 {dimension_numbers = #tpu.dot_dimension_numbers<[1], [0], [0], [1], [0, 0, 1, 1], [], []>} : vector<16x20xf32>, vector<20x192xf32>, vector<16x192xf32> -> vector<16x192xf32>
    %c2 = arith.constant 2 : index
    %c0_17 = arith.constant 0 : index
    %c0_18 = arith.constant 0 : index
    %17 = vector.load %arg1[%c2, %c0_17, %c0_18] : memref<4x16x20xf32, #tpu.memory_space<vmem>>, vector<1x16x20xf32>
    %18 = vector.shape_cast %17 : vector<1x16x20xf32> to vector<16x20xf32>
    %cst_19 = arith.constant dense<0.000000e+00> : vector<16x192xf32>
    %19 = tpu.matmul %18, %0, %cst_19 {dimension_numbers = #tpu.dot_dimension_numbers<[1], [0], [0], [1], [0, 0, 1, 1], [], []>} : vector<16x20xf32>, vector<20x192xf32>, vector<16x192xf32> -> vector<16x192xf32>
    %20 = arith.addf %19, %6 : vector<16x192xf32>
    %cst_20 = arith.constant dense<0.000000e+00> : vector<16x192xf32>
    %21 = tpu.matmul %18, %1, %cst_20 {dimension_numbers = #tpu.dot_dimension_numbers<[1], [0], [0], [1], [0, 0, 1, 1], [], []>} : vector<16x20xf32>, vector<20x192xf32>, vector<16x192xf32> -> vector<16x192xf32>
    %c3 = arith.constant 3 : index
    %c0_21 = arith.constant 0 : index
    %c0_22 = arith.constant 0 : index
    %22 = vector.load %arg1[%c3, %c0_21, %c0_22] : memref<4x16x20xf32, #tpu.memory_space<vmem>>, vector<1x16x20xf32>
    %23 = vector.shape_cast %22 : vector<1x16x20xf32> to vector<16x20xf32>
    %cst_23 = arith.constant dense<0.000000e+00> : vector<16x192xf32>
    %24 = tpu.matmul %23, %0, %cst_23 {dimension_numbers = #tpu.dot_dimension_numbers<[1], [0], [0], [1], [0, 0, 1, 1], [], []>} : vector<16x20xf32>, vector<20x192xf32>, vector<16x192xf32> -> vector<16x192xf32>
    %25 = arith.addf %24, %6 : vector<16x192xf32>
    %cst_24 = arith.constant dense<0.000000e+00> : vector<16x192xf32>
    %26 = tpu.matmul %23, %1, %cst_24 {dimension_numbers = #tpu.dot_dimension_numbers<[1], [0], [0], [1], [0, 0, 1, 1], [], []>} : vector<16x20xf32>, vector<20x192xf32>, vector<16x192xf32> -> vector<16x192xf32>
    %27 = arith.addf %10, %26 : vector<16x192xf32>
    %28 = arith.addf %15, %21 : vector<16x192xf32>
    %29 = arith.addf %20, %16 : vector<16x192xf32>
    %30 = arith.addf %25, %11 : vector<16x192xf32>
    %31 = vector.shape_cast %3 : vector<1x64xf32> to vector<1x64xf32>
    %32 = vector.broadcast %31 : vector<1x64xf32> to vector<16x64xf32>
    %cst_25 = arith.constant 0.000000e+00 : f32
    %33 = vector.broadcast %cst_25 : f32 to vector<16x64xf32>
    %cst_26 = arith.constant dense<0.000000e+00> : vector<16x192xf32>
    %34 = tpu.matmul %33, %4, %cst_26 {dimension_numbers = #tpu.dot_dimension_numbers<[1], [0], [0], [1], [0, 0, 1, 1], [], []>} : vector<16x64xf32>, vector<64x192xf32>, vector<16x192xf32> -> vector<16x192xf32>
    %35 = vector.extract_strided_slice %27 {offsets = [0, 0], sizes = [16, 128], strides = [1, 1]} : vector<16x192xf32> to vector<16x128xf32>
    %36 = vector.extract_strided_slice %34 {offsets = [0, 0], sizes = [16, 128], strides = [1, 1]} : vector<16x192xf32> to vector<16x128xf32>
    %37 = arith.addf %35, %36 : vector<16x128xf32>
    %38 = arith.negf %37 : vector<16x128xf32>
    %39 = math.exp %38 : vector<16x128xf32>
    %cst_27 = arith.constant 1.000000e+00 : f32
    %40 = vector.broadcast %cst_27 : f32 to vector<16x128xf32>
    %41 = arith.addf %40, %39 : vector<16x128xf32>
    %42 = arith.divf %40, %41 : vector<16x128xf32>
    %43 = vector.extract_strided_slice %42 {offsets = [0, 0], sizes = [16, 64], strides = [1, 1]} : vector<16x128xf32> to vector<16x64xf32>
    %44 = vector.extract_strided_slice %42 {offsets = [0, 64], sizes = [16, 64], strides = [1, 1]} : vector<16x128xf32> to vector<16x64xf32>
    %45 = vector.extract_strided_slice %27 {offsets = [0, 128], sizes = [16, 64], strides = [1, 1]} : vector<16x192xf32> to vector<16x64xf32>
    %46 = vector.extract_strided_slice %34 {offsets = [0, 128], sizes = [16, 64], strides = [1, 1]} : vector<16x192xf32> to vector<16x64xf32>
    %47 = arith.addf %46, %32 : vector<16x64xf32>
    %48 = arith.mulf %43, %47 : vector<16x64xf32>
    %49 = arith.addf %45, %48 : vector<16x64xf32>
    %50 = math.tanh %49 : vector<16x64xf32>
    %cst_28 = arith.constant 1.000000e+00 : f32
    %51 = vector.broadcast %cst_28 : f32 to vector<16x64xf32>
    %52 = arith.subf %51, %44 : vector<16x64xf32>
    %53 = arith.mulf %52, %50 : vector<16x64xf32>
    %54 = arith.mulf %44, %33 : vector<16x64xf32>
    %55 = arith.addf %53, %54 : vector<16x64xf32>
    %cst_29 = arith.constant dense<0.000000e+00> : vector<16x192xf32>
    %56 = tpu.matmul %55, %4, %cst_29 {dimension_numbers = #tpu.dot_dimension_numbers<[1], [0], [0], [1], [0, 0, 1, 1], [], []>} : vector<16x64xf32>, vector<64x192xf32>, vector<16x192xf32> -> vector<16x192xf32>
    %57 = vector.extract_strided_slice %28 {offsets = [0, 0], sizes = [16, 128], strides = [1, 1]} : vector<16x192xf32> to vector<16x128xf32>
    %58 = vector.extract_strided_slice %56 {offsets = [0, 0], sizes = [16, 128], strides = [1, 1]} : vector<16x192xf32> to vector<16x128xf32>
    %59 = arith.addf %57, %58 : vector<16x128xf32>
    %60 = arith.negf %59 : vector<16x128xf32>
    %61 = math.exp %60 : vector<16x128xf32>
    %cst_30 = arith.constant 1.000000e+00 : f32
    %62 = vector.broadcast %cst_30 : f32 to vector<16x128xf32>
    %63 = arith.addf %62, %61 : vector<16x128xf32>
    %64 = arith.divf %62, %63 : vector<16x128xf32>
    %65 = vector.extract_strided_slice %64 {offsets = [0, 0], sizes = [16, 64], strides = [1, 1]} : vector<16x128xf32> to vector<16x64xf32>
    %66 = vector.extract_strided_slice %64 {offsets = [0, 64], sizes = [16, 64], strides = [1, 1]} : vector<16x128xf32> to vector<16x64xf32>
    %67 = vector.extract_strided_slice %28 {offsets = [0, 128], sizes = [16, 64], strides = [1, 1]} : vector<16x192xf32> to vector<16x64xf32>
    %68 = vector.extract_strided_slice %56 {offsets = [0, 128], sizes = [16, 64], strides = [1, 1]} : vector<16x192xf32> to vector<16x64xf32>
    %69 = arith.addf %68, %32 : vector<16x64xf32>
    %70 = arith.mulf %65, %69 : vector<16x64xf32>
    %71 = arith.addf %67, %70 : vector<16x64xf32>
    %72 = math.tanh %71 : vector<16x64xf32>
    %cst_31 = arith.constant 1.000000e+00 : f32
    %73 = vector.broadcast %cst_31 : f32 to vector<16x64xf32>
    %74 = arith.subf %73, %66 : vector<16x64xf32>
    %75 = arith.mulf %74, %72 : vector<16x64xf32>
    %76 = arith.mulf %66, %55 : vector<16x64xf32>
    %77 = arith.addf %75, %76 : vector<16x64xf32>
    %cst_32 = arith.constant dense<0.000000e+00> : vector<16x192xf32>
    %78 = tpu.matmul %77, %4, %cst_32 {dimension_numbers = #tpu.dot_dimension_numbers<[1], [0], [0], [1], [0, 0, 1, 1], [], []>} : vector<16x64xf32>, vector<64x192xf32>, vector<16x192xf32> -> vector<16x192xf32>
    %79 = vector.extract_strided_slice %29 {offsets = [0, 0], sizes = [16, 128], strides = [1, 1]} : vector<16x192xf32> to vector<16x128xf32>
    %80 = vector.extract_strided_slice %78 {offsets = [0, 0], sizes = [16, 128], strides = [1, 1]} : vector<16x192xf32> to vector<16x128xf32>
    %81 = arith.addf %79, %80 : vector<16x128xf32>
    %82 = arith.negf %81 : vector<16x128xf32>
    %83 = math.exp %82 : vector<16x128xf32>
    %cst_33 = arith.constant 1.000000e+00 : f32
    %84 = vector.broadcast %cst_33 : f32 to vector<16x128xf32>
    %85 = arith.addf %84, %83 : vector<16x128xf32>
    %86 = arith.divf %84, %85 : vector<16x128xf32>
    %87 = vector.extract_strided_slice %86 {offsets = [0, 0], sizes = [16, 64], strides = [1, 1]} : vector<16x128xf32> to vector<16x64xf32>
    %88 = vector.extract_strided_slice %86 {offsets = [0, 64], sizes = [16, 64], strides = [1, 1]} : vector<16x128xf32> to vector<16x64xf32>
    %89 = vector.extract_strided_slice %29 {offsets = [0, 128], sizes = [16, 64], strides = [1, 1]} : vector<16x192xf32> to vector<16x64xf32>
    %90 = vector.extract_strided_slice %78 {offsets = [0, 128], sizes = [16, 64], strides = [1, 1]} : vector<16x192xf32> to vector<16x64xf32>
    %91 = arith.addf %90, %32 : vector<16x64xf32>
    %92 = arith.mulf %87, %91 : vector<16x64xf32>
    %93 = arith.addf %89, %92 : vector<16x64xf32>
    %94 = math.tanh %93 : vector<16x64xf32>
    %cst_34 = arith.constant 1.000000e+00 : f32
    %95 = vector.broadcast %cst_34 : f32 to vector<16x64xf32>
    %96 = arith.subf %95, %88 : vector<16x64xf32>
    %97 = arith.mulf %96, %94 : vector<16x64xf32>
    %98 = arith.mulf %88, %77 : vector<16x64xf32>
    %99 = arith.addf %97, %98 : vector<16x64xf32>
    %cst_35 = arith.constant dense<0.000000e+00> : vector<16x192xf32>
    %100 = tpu.matmul %99, %4, %cst_35 {dimension_numbers = #tpu.dot_dimension_numbers<[1], [0], [0], [1], [0, 0, 1, 1], [], []>} : vector<16x64xf32>, vector<64x192xf32>, vector<16x192xf32> -> vector<16x192xf32>
    %101 = vector.extract_strided_slice %30 {offsets = [0, 0], sizes = [16, 128], strides = [1, 1]} : vector<16x192xf32> to vector<16x128xf32>
    %102 = vector.extract_strided_slice %100 {offsets = [0, 0], sizes = [16, 128], strides = [1, 1]} : vector<16x192xf32> to vector<16x128xf32>
    %103 = arith.addf %101, %102 : vector<16x128xf32>
    %104 = arith.negf %103 : vector<16x128xf32>
    %105 = math.exp %104 : vector<16x128xf32>
    %cst_36 = arith.constant 1.000000e+00 : f32
    %106 = vector.broadcast %cst_36 : f32 to vector<16x128xf32>
    %107 = arith.addf %106, %105 : vector<16x128xf32>
    %108 = arith.divf %106, %107 : vector<16x128xf32>
    %109 = vector.extract_strided_slice %108 {offsets = [0, 0], sizes = [16, 64], strides = [1, 1]} : vector<16x128xf32> to vector<16x64xf32>
    %110 = vector.extract_strided_slice %108 {offsets = [0, 64], sizes = [16, 64], strides = [1, 1]} : vector<16x128xf32> to vector<16x64xf32>
    %111 = vector.extract_strided_slice %30 {offsets = [0, 128], sizes = [16, 64], strides = [1, 1]} : vector<16x192xf32> to vector<16x64xf32>
    %112 = vector.extract_strided_slice %100 {offsets = [0, 128], sizes = [16, 64], strides = [1, 1]} : vector<16x192xf32> to vector<16x64xf32>
    %113 = arith.addf %112, %32 : vector<16x64xf32>
    %114 = arith.mulf %109, %113 : vector<16x64xf32>
    %115 = arith.addf %111, %114 : vector<16x64xf32>
    %116 = math.tanh %115 : vector<16x64xf32>
    %cst_37 = arith.constant 1.000000e+00 : f32
    %117 = vector.broadcast %cst_37 : f32 to vector<16x64xf32>
    %118 = arith.subf %117, %110 : vector<16x64xf32>
    %119 = arith.mulf %118, %116 : vector<16x64xf32>
    %120 = arith.mulf %110, %99 : vector<16x64xf32>
    %121 = arith.addf %119, %120 : vector<16x64xf32>
    %c0_38 = arith.constant 0 : index
    %c0_39 = arith.constant 0 : index
    %122 = vector.load %arg7[%c0_38, %c0_39] : memref<64x384xf32, #tpu.memory_space<vmem>>, vector<64x384xf32>
    %c0_40 = arith.constant 0 : index
    %c0_41 = arith.constant 0 : index
    %123 = vector.load %arg8[%c0_40, %c0_41] : memref<1x384xf32, #tpu.memory_space<vmem>>, vector<1x384xf32>
    %c0_42 = arith.constant 0 : index
    %c0_43 = arith.constant 0 : index
    %124 = vector.load %arg9[%c0_42, %c0_43] : memref<1x128xf32, #tpu.memory_space<vmem>>, vector<1x128xf32>
    %c0_44 = arith.constant 0 : index
    %c0_45 = arith.constant 0 : index
    %125 = vector.load %arg10[%c0_44, %c0_45] : memref<128x384xf32, #tpu.memory_space<vmem>>, vector<128x384xf32>
    %126 = vector.shape_cast %123 : vector<1x384xf32> to vector<1x384xf32>
    %127 = vector.broadcast %126 : vector<1x384xf32> to vector<16x384xf32>
    %cst_46 = arith.constant dense<0.000000e+00> : vector<16x384xf32>
    %128 = tpu.matmul %55, %122, %cst_46 {dimension_numbers = #tpu.dot_dimension_numbers<[1], [0], [0], [1], [0, 0, 1, 1], [], []>} : vector<16x64xf32>, vector<64x384xf32>, vector<16x384xf32> -> vector<16x384xf32>
    %129 = arith.addf %128, %127 : vector<16x384xf32>
    %cst_47 = arith.constant dense<0.000000e+00> : vector<16x384xf32>
    %130 = tpu.matmul %77, %122, %cst_47 {dimension_numbers = #tpu.dot_dimension_numbers<[1], [0], [0], [1], [0, 0, 1, 1], [], []>} : vector<16x64xf32>, vector<64x384xf32>, vector<16x384xf32> -> vector<16x384xf32>
    %131 = arith.addf %130, %127 : vector<16x384xf32>
    %cst_48 = arith.constant dense<0.000000e+00> : vector<16x384xf32>
    %132 = tpu.matmul %99, %122, %cst_48 {dimension_numbers = #tpu.dot_dimension_numbers<[1], [0], [0], [1], [0, 0, 1, 1], [], []>} : vector<16x64xf32>, vector<64x384xf32>, vector<16x384xf32> -> vector<16x384xf32>
    %133 = arith.addf %132, %127 : vector<16x384xf32>
    %cst_49 = arith.constant dense<0.000000e+00> : vector<16x384xf32>
    %134 = tpu.matmul %121, %122, %cst_49 {dimension_numbers = #tpu.dot_dimension_numbers<[1], [0], [0], [1], [0, 0, 1, 1], [], []>} : vector<16x64xf32>, vector<64x384xf32>, vector<16x384xf32> -> vector<16x384xf32>
    %135 = arith.addf %134, %127 : vector<16x384xf32>
    %136 = vector.shape_cast %124 : vector<1x128xf32> to vector<1x128xf32>
    %137 = vector.broadcast %136 : vector<1x128xf32> to vector<16x128xf32>
    %cst_50 = arith.constant 0.000000e+00 : f32
    %138 = vector.broadcast %cst_50 : f32 to vector<16x128xf32>
    %cst_51 = arith.constant dense<0.000000e+00> : vector<16x384xf32>
    %139 = tpu.matmul %138, %125, %cst_51 {dimension_numbers = #tpu.dot_dimension_numbers<[1], [0], [0], [1], [0, 0, 1, 1], [], []>} : vector<16x128xf32>, vector<128x384xf32>, vector<16x384xf32> -> vector<16x384xf32>
    %140 = vector.extract_strided_slice %129 {offsets = [0, 0], sizes = [16, 256], strides = [1, 1]} : vector<16x384xf32> to vector<16x256xf32>
    %141 = vector.extract_strided_slice %139 {offsets = [0, 0], sizes = [16, 256], strides = [1, 1]} : vector<16x384xf32> to vector<16x256xf32>
    %142 = arith.addf %140, %141 : vector<16x256xf32>
    %143 = arith.negf %142 : vector<16x256xf32>
    %144 = math.exp %143 : vector<16x256xf32>
    %cst_52 = arith.constant 1.000000e+00 : f32
    %145 = vector.broadcast %cst_52 : f32 to vector<16x256xf32>
    %146 = arith.addf %145, %144 : vector<16x256xf32>
    %147 = arith.divf %145, %146 : vector<16x256xf32>
    %148 = vector.extract_strided_slice %147 {offsets = [0, 0], sizes = [16, 128], strides = [1, 1]} : vector<16x256xf32> to vector<16x128xf32>
    %149 = vector.extract_strided_slice %147 {offsets = [0, 128], sizes = [16, 128], strides = [1, 1]} : vector<16x256xf32> to vector<16x128xf32>
    %150 = vector.extract_strided_slice %129 {offsets = [0, 256], sizes = [16, 128], strides = [1, 1]} : vector<16x384xf32> to vector<16x128xf32>
    %151 = vector.extract_strided_slice %139 {offsets = [0, 256], sizes = [16, 128], strides = [1, 1]} : vector<16x384xf32> to vector<16x128xf32>
    %152 = arith.addf %151, %137 : vector<16x128xf32>
    %153 = arith.mulf %148, %152 : vector<16x128xf32>
    %154 = arith.addf %150, %153 : vector<16x128xf32>
    %155 = math.tanh %154 : vector<16x128xf32>
    %cst_53 = arith.constant 1.000000e+00 : f32
    %156 = vector.broadcast %cst_53 : f32 to vector<16x128xf32>
    %157 = arith.subf %156, %149 : vector<16x128xf32>
    %158 = arith.mulf %157, %155 : vector<16x128xf32>
    %159 = arith.mulf %149, %138 : vector<16x128xf32>
    %160 = arith.addf %158, %159 : vector<16x128xf32>
    %cst_54 = arith.constant dense<0.000000e+00> : vector<16x384xf32>
    %161 = tpu.matmul %160, %125, %cst_54 {dimension_numbers = #tpu.dot_dimension_numbers<[1], [0], [0], [1], [0, 0, 1, 1], [], []>} : vector<16x128xf32>, vector<128x384xf32>, vector<16x384xf32> -> vector<16x384xf32>
    %162 = vector.extract_strided_slice %131 {offsets = [0, 0], sizes = [16, 256], strides = [1, 1]} : vector<16x384xf32> to vector<16x256xf32>
    %163 = vector.extract_strided_slice %161 {offsets = [0, 0], sizes = [16, 256], strides = [1, 1]} : vector<16x384xf32> to vector<16x256xf32>
    %164 = arith.addf %162, %163 : vector<16x256xf32>
    %165 = arith.negf %164 : vector<16x256xf32>
    %166 = math.exp %165 : vector<16x256xf32>
    %cst_55 = arith.constant 1.000000e+00 : f32
    %167 = vector.broadcast %cst_55 : f32 to vector<16x256xf32>
    %168 = arith.addf %167, %166 : vector<16x256xf32>
    %169 = arith.divf %167, %168 : vector<16x256xf32>
    %170 = vector.extract_strided_slice %169 {offsets = [0, 0], sizes = [16, 128], strides = [1, 1]} : vector<16x256xf32> to vector<16x128xf32>
    %171 = vector.extract_strided_slice %169 {offsets = [0, 128], sizes = [16, 128], strides = [1, 1]} : vector<16x256xf32> to vector<16x128xf32>
    %172 = vector.extract_strided_slice %131 {offsets = [0, 256], sizes = [16, 128], strides = [1, 1]} : vector<16x384xf32> to vector<16x128xf32>
    %173 = vector.extract_strided_slice %161 {offsets = [0, 256], sizes = [16, 128], strides = [1, 1]} : vector<16x384xf32> to vector<16x128xf32>
    %174 = arith.addf %173, %137 : vector<16x128xf32>
    %175 = arith.mulf %170, %174 : vector<16x128xf32>
    %176 = arith.addf %172, %175 : vector<16x128xf32>
    %177 = math.tanh %176 : vector<16x128xf32>
    %cst_56 = arith.constant 1.000000e+00 : f32
    %178 = vector.broadcast %cst_56 : f32 to vector<16x128xf32>
    %179 = arith.subf %178, %171 : vector<16x128xf32>
    %180 = arith.mulf %179, %177 : vector<16x128xf32>
    %181 = arith.mulf %171, %160 : vector<16x128xf32>
    %182 = arith.addf %180, %181 : vector<16x128xf32>
    %cst_57 = arith.constant dense<0.000000e+00> : vector<16x384xf32>
    %183 = tpu.matmul %182, %125, %cst_57 {dimension_numbers = #tpu.dot_dimension_numbers<[1], [0], [0], [1], [0, 0, 1, 1], [], []>} : vector<16x128xf32>, vector<128x384xf32>, vector<16x384xf32> -> vector<16x384xf32>
    %184 = vector.extract_strided_slice %133 {offsets = [0, 0], sizes = [16, 256], strides = [1, 1]} : vector<16x384xf32> to vector<16x256xf32>
    %185 = vector.extract_strided_slice %183 {offsets = [0, 0], sizes = [16, 256], strides = [1, 1]} : vector<16x384xf32> to vector<16x256xf32>
    %186 = arith.addf %184, %185 : vector<16x256xf32>
    %187 = arith.negf %186 : vector<16x256xf32>
    %188 = math.exp %187 : vector<16x256xf32>
    %cst_58 = arith.constant 1.000000e+00 : f32
    %189 = vector.broadcast %cst_58 : f32 to vector<16x256xf32>
    %190 = arith.addf %189, %188 : vector<16x256xf32>
    %191 = arith.divf %189, %190 : vector<16x256xf32>
    %192 = vector.extract_strided_slice %191 {offsets = [0, 0], sizes = [16, 128], strides = [1, 1]} : vector<16x256xf32> to vector<16x128xf32>
    %193 = vector.extract_strided_slice %191 {offsets = [0, 128], sizes = [16, 128], strides = [1, 1]} : vector<16x256xf32> to vector<16x128xf32>
    %194 = vector.extract_strided_slice %133 {offsets = [0, 256], sizes = [16, 128], strides = [1, 1]} : vector<16x384xf32> to vector<16x128xf32>
    %195 = vector.extract_strided_slice %183 {offsets = [0, 256], sizes = [16, 128], strides = [1, 1]} : vector<16x384xf32> to vector<16x128xf32>
    %196 = arith.addf %195, %137 : vector<16x128xf32>
    %197 = arith.mulf %192, %196 : vector<16x128xf32>
    %198 = arith.addf %194, %197 : vector<16x128xf32>
    %199 = math.tanh %198 : vector<16x128xf32>
    %cst_59 = arith.constant 1.000000e+00 : f32
    %200 = vector.broadcast %cst_59 : f32 to vector<16x128xf32>
    %201 = arith.subf %200, %193 : vector<16x128xf32>
    %202 = arith.mulf %201, %199 : vector<16x128xf32>
    %203 = arith.mulf %193, %182 : vector<16x128xf32>
    %204 = arith.addf %202, %203 : vector<16x128xf32>
    %cst_60 = arith.constant dense<0.000000e+00> : vector<16x384xf32>
    %205 = tpu.matmul %204, %125, %cst_60 {dimension_numbers = #tpu.dot_dimension_numbers<[1], [0], [0], [1], [0, 0, 1, 1], [], []>} : vector<16x128xf32>, vector<128x384xf32>, vector<16x384xf32> -> vector<16x384xf32>
    %206 = vector.extract_strided_slice %135 {offsets = [0, 0], sizes = [16, 256], strides = [1, 1]} : vector<16x384xf32> to vector<16x256xf32>
    %207 = vector.extract_strided_slice %205 {offsets = [0, 0], sizes = [16, 256], strides = [1, 1]} : vector<16x384xf32> to vector<16x256xf32>
    %208 = arith.addf %206, %207 : vector<16x256xf32>
    %209 = arith.negf %208 : vector<16x256xf32>
    %210 = math.exp %209 : vector<16x256xf32>
    %cst_61 = arith.constant 1.000000e+00 : f32
    %211 = vector.broadcast %cst_61 : f32 to vector<16x256xf32>
    %212 = arith.addf %211, %210 : vector<16x256xf32>
    %213 = arith.divf %211, %212 : vector<16x256xf32>
    %214 = vector.extract_strided_slice %213 {offsets = [0, 0], sizes = [16, 128], strides = [1, 1]} : vector<16x256xf32> to vector<16x128xf32>
    %215 = vector.extract_strided_slice %213 {offsets = [0, 128], sizes = [16, 128], strides = [1, 1]} : vector<16x256xf32> to vector<16x128xf32>
    %216 = vector.extract_strided_slice %135 {offsets = [0, 256], sizes = [16, 128], strides = [1, 1]} : vector<16x384xf32> to vector<16x128xf32>
    %217 = vector.extract_strided_slice %205 {offsets = [0, 256], sizes = [16, 128], strides = [1, 1]} : vector<16x384xf32> to vector<16x128xf32>
    %218 = arith.addf %217, %137 : vector<16x128xf32>
    %219 = arith.mulf %214, %218 : vector<16x128xf32>
    %220 = arith.addf %216, %219 : vector<16x128xf32>
    %221 = math.tanh %220 : vector<16x128xf32>
    %cst_62 = arith.constant 1.000000e+00 : f32
    %222 = vector.broadcast %cst_62 : f32 to vector<16x128xf32>
    %223 = arith.subf %222, %215 : vector<16x128xf32>
    %224 = arith.mulf %223, %221 : vector<16x128xf32>
    %225 = arith.mulf %215, %204 : vector<16x128xf32>
    %226 = arith.addf %224, %225 : vector<16x128xf32>
    %227 = tpu.concatenate %160, %182, %204, %226 in 1 : vector<16x128xf32>, vector<16x128xf32>, vector<16x128xf32>, vector<16x128xf32> -> vector<16x512xf32>
    %c0_63 = arith.constant 0 : index
    %c0_64 = arith.constant 0 : index
    %228 = vector.load %arg11[%c0_63, %c0_64] : memref<16x512xf32, #tpu.memory_space<vmem>>, vector<16x512xf32>
    tpu.vector_store %arg11[%c0_63, %c0_64], %227 {strides = array<i32>} : memref<16x512xf32, #tpu.memory_space<vmem>>, vector<16x512xf32>,
    return
  }
  func.func @transform_0(%arg0: i32) -> (i32, i32, i32) {
    %c0_i32 = arith.constant 0 : i32
    %c0_i32_0 = arith.constant 0 : i32
    %c0_i32_1 = arith.constant 0 : i32
    return %c0_i32, %arg0, %c0_i32_0 : i32, i32, i32
  }
  func.func @transform_1(%arg0: i32) -> (i32, i32) {
    %c0_i32 = arith.constant 0 : i32
    %c0_i32_0 = arith.constant 0 : i32
    %c0_i32_1 = arith.constant 0 : i32
    return %c0_i32, %c0_i32_0 : i32, i32
  }
  func.func @transform_2(%arg0: i32) -> (i32, i32) {
    %c0_i32 = arith.constant 0 : i32
    %c0_i32_0 = arith.constant 0 : i32
    %c0_i32_1 = arith.constant 0 : i32
    return %c0_i32, %c0_i32_0 : i32, i32
  }
  func.func @transform_3(%arg0: i32) -> (i32, i32) {
    %c0_i32 = arith.constant 0 : i32
    %c0_i32_0 = arith.constant 0 : i32
    %c0_i32_1 = arith.constant 0 : i32
    return %c0_i32, %c0_i32_0 : i32, i32
  }
  func.func @transform_4(%arg0: i32) -> (i32, i32) {
    %c0_i32 = arith.constant 0 : i32
    %c0_i32_0 = arith.constant 0 : i32
    %c0_i32_1 = arith.constant 0 : i32
    return %c0_i32, %c0_i32_0 : i32, i32
  }
  func.func @transform_5(%arg0: i32) -> (i32, i32) {
    %c0_i32 = arith.constant 0 : i32
    %c0_i32_0 = arith.constant 0 : i32
    %c0_i32_1 = arith.constant 0 : i32
    return %c0_i32, %c0_i32_0 : i32, i32
  }
  func.func @transform_6(%arg0: i32) -> (i32, i32) {
    %c0_i32 = arith.constant 0 : i32
    %c0_i32_0 = arith.constant 0 : i32
    %c0_i32_1 = arith.constant 0 : i32
    return %c0_i32, %c0_i32_0 : i32, i32
  }
  func.func @transform_7(%arg0: i32) -> (i32, i32) {
    %c0_i32 = arith.constant 0 : i32
    %c0_i32_0 = arith.constant 0 : i32
    %c0_i32_1 = arith.constant 0 : i32
    return %c0_i32, %c0_i32_0 : i32, i32
  }
  func.func @transform_8(%arg0: i32) -> (i32, i32) {
    %c0_i32 = arith.constant 0 : i32
    %c0_i32_0 = arith.constant 0 : i32
    %c0_i32_1 = arith.constant 0 : i32
    return %c0_i32, %c0_i32_0 : i32, i32
  }
  func.func @transform_9(%arg0: i32) -> (i32, i32) {
    %c0_i32 = arith.constant 0 : i32
    %c0_i32_0 = arith.constant 0 : i32
    %c0_i32_1 = arith.constant 0 : i32
    return %c0_i32, %c0_i32_0 : i32, i32
  }
  func.func @transform_10(%arg0: i32) -> (i32, i32) {
    %c0_i32 = arith.constant 0 : i32
    %c0_i32_0 = arith.constant 0 : i32
    return %arg0, %c0_i32 : i32, i32
  }
}

</mosaic_0001>

<bundles_post_ra>
// kernel: tpu_custom_call.1
= control target key start
LH: loop header
LB: loop body
LE: loop exit
PB: predicated region body
PF: predicated region fallthrough
CT: control target
= control target key end

     0   :  { %15 = vsyncpa [#allocation3], 0  ;;  %s4929_s0 = inlined_call_operand.hbm [shape: f32[4,16,20], index: 0, kind: input, shape index: {}]   ;;  %s4930_s1 = inlined_call_operand.hbm [shape: f32[20,192], index: 1, kind: input, shape index: {}]   ;;  %s4931_s2 = inlined_call_operand.hbm [shape: f32[20,192], index: 2, kind: input, shape index: {}]   ;;  %s4932_s3 = inlined_call_operand.vmem [shape: f32[1,192], index: 3, kind: input, shape index: {}]   ;;  %s4933_s4 = inlined_call_operand.vmem [shape: f32[1,64], index: 4, kind: input, shape index: {}]   ;;  %s4934_s5 = inlined_call_operand.hbm [shape: f32[64,192], index: 5, kind: input, shape index: {}]   ;;  %s4935_s6 = inlined_call_operand.hbm [shape: f32[64,384], index: 6, kind: input, shape index: {}]   ;;  %s4936_s7 = inlined_call_operand.vmem [shape: f32[1,384], index: 7, kind: input, shape index: {}]   ;;  %s4937_s8 = inlined_call_operand.vmem [shape: f32[1,128], index: 8, kind: input, shape index: {}]   ;;  %s4938_s9 = inlined_call_operand.hbm [shape: f32[128,384], index: 9, kind: input, shape index: {}]   ;;  %s4939_s10 = inlined_call_operand.hbm [shape: f32[16,512], index: 10, kind: output, shape index: {}]  }
   0x1   :  { %16 = vsyncpa [#allocation6], 0 }
   0x2   :  { %17 = vsyncpa [#allocation9], 0 }
   0x3   :  { %18 = vsyncpa [#allocation12], 0 }
   0x4   :  { %19 = vsyncpa [#allocation4], 0  ;;  %s4127_s13 = smov [#allocation5]   ;;  %s3963_s17 = scalar_lea.hbm %s4930_s1, 768 }
   0x5   :  { %s37_s14 = sshll.u32 %s4127_s13, 4  ;;  %p3964_p0 = scmp.ne.s32.totalorder %s4930_s1, %s3963_s17  ;;  %s38_s14 = int_to_ptr.vmem [resolvable:$true] %s37_s14 }
   0x6   :  { %p3967_p1 = scmp.lt.u32.totalorder %s3963_s17, %s4930_s1 }
   0x8   :  { %p3969_p2 = pnand %p3967_p1, %p3964_p0 }
   0xa   :  { %3972 = shalt.err (!%p3969_p2)
}
   0xb   :  { %s3973_s22 = scalar_lea.vmem %s38_s14, 768  ;;  %p3978_p4 = scmp.lt.s32.totalorder %s38_s14, %s38_s14 }
   0xc   :  { %p3974_p3 = scmp.ne.s32.totalorder %s38_s14, %s3973_s22  ;;  %p3979_p5 = scmp.lt.s32.totalorder %s3973_s22, %s3973_s22 }
   0xe   :  { %p3980_p6 = por %p3979_p5, %p3978_p4 }
  0x10   :  { %p3981_p7 = pnand %p3980_p6, %p3974_p3 }
  0x12   :  { %3984 = shalt.err (!%p3981_p7)
}
  0x13   :  { %s4128_s23 = smov 256   ;;  %s4129_s24 = smov 16  }
  0x14   :  { %43 = dma.hbm_to_vmem [thread:$0]  %s4930_s1, 768, %s38_s14, [#allocation6], %s4128_s23, %s4128_s23, %s4129_s24  }
  0x15   :  { %s4130_s27 = smov [#allocation8]   ;;  %s4131_s29 = smov [#allocation2]  }
  0x16   :  { %s65_s28 = sshll.u32 %s4130_s27, 4  ;;  %s25_s30 = sshll.u32 %s4131_s29, 4  ;;  %s66_s28 = int_to_ptr.vmem [resolvable:$true] %s65_s28  ;;  %s26_s30 = int_to_ptr.vmem [resolvable:$true] %s25_s30 }
  0x17   :  { %s3985_s13 = scalar_lea.hbm %s4934_s5, 2048 }
  0x18   :  { %p3986_p8 = scmp.ne.s32.totalorder %s4934_s5, %s3985_s13  ;;  %p3989_p9 = scmp.lt.u32.totalorder %s3985_s13, %s4934_s5 }
  0x1a   :  { %p3991_p10 = pnand %p3989_p9, %p3986_p8 }
  0x1c   :  { %3994 = shalt.err (!%p3991_p10)
}
  0x1d   :  { %s3995_s1 = scalar_lea.vmem %s66_s28, 2048  ;;  %p4000_p12 = scmp.lt.s32.totalorder %s66_s28, %s66_s28 }
  0x1e   :  { %p3996_p11 = scmp.ne.s32.totalorder %s66_s28, %s3995_s1  ;;  %p4001_p13 = scmp.lt.s32.totalorder %s3995_s1, %s3995_s1 }
  0x20   :  { %p4002_p0 = por %p4001_p13, %p4000_p12 }
  0x22   :  { %p4003_p1 = pnand %p4002_p0, %p3996_p11 }
  0x24   :  { %4006 = shalt.err (!%p4003_p1)
}
  0x25   :  { %71 = dma.hbm_to_vmem [thread:$0]  %s4934_s5, 2048, %s66_s28, [#allocation9], %s4128_s23, %s4128_s23, %s4129_s24  }
  0x26   :  { %s4007_s22 = scalar_lea.hbm %s4929_s0, 1024 }
  0x27   :  { %p4008_p2 = scmp.ne.s32.totalorder %s4929_s0, %s4007_s22  ;;  %p4011_p3 = scmp.lt.u32.totalorder %s4007_s22, %s4929_s0 }
  0x29   :  { %p4013_p4 = pnand %p4011_p3, %p4008_p2 }
  0x2b   :  { %4016 = shalt.err (!%p4013_p4)
}
  0x2c   :  { %s4017_s11 = scalar_lea.vmem %s26_s30, 1024  ;;  %p4022_p6 = scmp.lt.s32.totalorder %s26_s30, %s26_s30 }
  0x2d   :  { %p4018_p5 = scmp.ne.s32.totalorder %s26_s30, %s4017_s11  ;;  %p4023_p7 = scmp.lt.s32.totalorder %s4017_s11, %s4017_s11 }
  0x2f   :  { %p4024_p8 = por %p4023_p7, %p4022_p6 }
  0x31   :  { %p4025_p9 = pnand %p4024_p8, %p4018_p5 }
  0x33   :  { %4028 = shalt.err (!%p4025_p9)
}
  0x34   :  { %s4132_s5 = smov 128   ;;  %s4133_s28 = smov 8  }
  0x35   :  { %31 = dma.hbm_to_vmem [thread:$0]  %s4929_s0, 1024, %s26_s30, [#allocation3], %s4132_s5, %s4132_s5, %s4133_s28  }
  0x36   :  { %s4134_s15 = smov [#allocation7]   ;;  %s4135_s17 = smov [#allocation10]  }
  0x37   :  { %s49_s16 = sshll.u32 %s4134_s15, 4  ;;  %s77_s18 = sshll.u32 %s4135_s17, 4  ;;  %s50_s16 = int_to_ptr.vmem [resolvable:$true] %s49_s16  ;;  %s78_s18 = int_to_ptr.vmem [resolvable:$true] %s77_s18 }
  0x38   :  { %s4029_s19 = scalar_lea.hbm %s4931_s2, 768 }
  0x39   :  { %p4030_p10 = scmp.ne.s32.totalorder %s4931_s2, %s4029_s19  ;;  %p4033_p11 = scmp.lt.u32.totalorder %s4029_s19, %s4931_s2 }
  0x3b   :  { %p4035_p12 = pnand %p4033_p11, %p4030_p10 }
  0x3d   :  { %4038 = shalt.err (!%p4035_p12)
}
  0x3e   :  { %s4039_s0 = scalar_lea.vmem %s50_s16, 768  ;;  %p4044_p0 = scmp.lt.s32.totalorder %s50_s16, %s50_s16 }
  0x3f   :  { %p4040_p13 = scmp.ne.s32.totalorder %s50_s16, %s4039_s0  ;;  %p4045_p1 = scmp.lt.s32.totalorder %s4039_s0, %s4039_s0 }
  0x41   :  { %p4046_p2 = por %p4045_p1, %p4044_p0 }
  0x43   :  { %p4047_p3 = pnand %p4046_p2, %p4040_p13 }
  0x45   :  { %4050 = shalt.err (!%p4047_p3)
}
  0x46   :  { %55 = dma.hbm_to_vmem [thread:$0]  %s4931_s2, 768, %s50_s16, [#allocation6], %s4128_s23, %s4128_s23, %s4129_s24  }
  0x47   :  { %s4051_s11 = scalar_lea.hbm %s4935_s6, 3072 }
  0x48   :  { %p4052_p4 = scmp.ne.s32.totalorder %s4935_s6, %s4051_s11  ;;  %p4055_p5 = scmp.lt.u32.totalorder %s4051_s11, %s4935_s6 }
  0x4a   :  { %p4057_p6 = pnand %p4055_p5, %p4052_p4 }
  0x4c   :  { %4060 = shalt.err (!%p4057_p6)
}
  0x4d   :  { %s4061_s15 = scalar_lea.vmem %s78_s18, 3072  ;;  %p4066_p8 = scmp.lt.s32.totalorder %s78_s18, %s78_s18 }
  0x4e   :  { %p4062_p7 = scmp.ne.s32.totalorder %s78_s18, %s4061_s15  ;;  %p4067_p9 = scmp.lt.s32.totalorder %s4061_s15, %s4061_s15 }
  0x50   :  { %p4068_p10 = por %p4067_p9, %p4066_p8 }
  0x52   :  { %p4069_p11 = pnand %p4068_p10, %p4062_p7 }
  0x54   :  { %4072 = shalt.err (!%p4069_p11)
}
  0x55   :  { %s4136_s2 = smov 384   ;;  %s4137_s23 = smov 24  }
  0x56   :  { %83 = dma.hbm_to_vmem [thread:$0]  %s4935_s6, 3072, %s78_s18, [#allocation9], %s4136_s2, %s4136_s2, %s4137_s23  }
  0x57   :  { %s4138_s17 = smov [#allocation11]   ;;  %s4073_s20 = scalar_lea.hbm %s4938_s9, 6144 }
  0x58   :  { %s93_s1 = sshll.u32 %s4138_s17, 4  ;;  %p4074_p12 = scmp.ne.s32.totalorder %s4938_s9, %s4073_s20  ;;  %s94_s1 = int_to_ptr.vmem [resolvable:$true] %s93_s1 }
  0x59   :  { %p4077_p13 = scmp.lt.u32.totalorder %s4073_s20, %s4938_s9 }
  0x5b   :  { %p4079_p0 = pnand %p4077_p13, %p4074_p12 }
  0x5d   :  { %4082 = shalt.err (!%p4079_p0)
}
  0x5e   :  { %s4083_s30 = scalar_lea.vmem %s94_s1, 6144  ;;  %p4088_p2 = scmp.lt.s32.totalorder %s94_s1, %s94_s1 }
  0x5f   :  { %p4084_p1 = scmp.ne.s32.totalorder %s94_s1, %s4083_s30  ;;  %p4089_p3 = scmp.lt.s32.totalorder %s4083_s30, %s4083_s30 }
  0x61   :  { %p4090_p4 = por %p4089_p3, %p4088_p2 }
  0x63   :  { %p4091_p5 = pnand %p4090_p4, %p4084_p1 }
  0x65   :  { %4094 = shalt.err (!%p4091_p5)
}
  0x66   :  { %99 = dma.hbm_to_vmem [thread:$0]  %s4938_s9, 6144, %s94_s1, [#allocation12], %s4136_s2, %s4136_s2, %s4137_s23  }
  0x67   :  { %4117 = dma.done.wait [#allocation3], 1024  }
  0x68   :  { %4118 = vsyncadd [#allocation3], 4294966272 }
  0x69   :  { %4119 = dma.done.wait [#allocation6], 1536  }
  0x6a   :  { %4120 = vsyncadd [#allocation6], 4294965760 }
  0x6b   :  { %4121 = dma.done.wait [#allocation9], 5120  }
  0x6c   :  { %4122 = vsyncadd [#allocation9], 4294962176 }
  0x6d   :  { %4123 = dma.done.wait [#allocation12], 6144  }
  0x6e   :  { %4124 = vsyncadd [#allocation12], 4294961152  ;;  %v4139_v0 = vmov 0.0   ;;  %v119_v1 = vld [vmem:[#allocation5 + $0x8] sm:$0xff]  ;;  %v121_v2 = vld [vmem:[#allocation5 + $0x18] sm:$0xff]  ;;  %vm168_vm0 = vcmask 1043456   ;;  %v149_v54 = vlaneseq }
  0x6f   :  { %239 = vmatprep.mubr.f32.mxu0 %v4139_v0  ;;  %322 = vmatprep.mubr.f32.mxu1 %v4139_v0  ;;  %v118_v3 = vld [vmem:[#allocation5] sm:$0xff]  ;;  %v4282_v4 = vpack.c.bf16 %v121_v2, %v119_v1  ;;  %v120_v5 = vld [vmem:[#allocation5 + $0x10] sm:$0xff]  ;;  %v4286_v7 = vld [vmem:[#allocation5 + $0x28] sm:$0xf]  ;;  %vm161_vm1 = vcmask 162816   ;;  %vm846_vm2 = vcmask 523264  }
  0x70   :  { %v4284_v6 = vpack.c.bf16 %v120_v5, %v118_v3  ;;  %v125_v8 = vld [vmem:[#allocation7 + $0x8] sm:$0xff]  ;;  %v127_v9 = vld [vmem:[#allocation7 + $0x18] sm:$0xff]  ;;  %v124_v10 = vld [vmem:[#allocation7] sm:$0xff]  ;;  %v4407_v57 = vshrl.u32 %v149_v54, 7 }
  0x71   :  { %3275 = vmatprep.subr.bf16.mxu0 %v4282_v4  ;;  %v3278_v11 = vpack.c.bf16 %v127_v9, %v125_v8  ;;  %v126_v12 = vld [vmem:[#allocation7 + $0x10] sm:$0xff]  ;;  %v129_v16 = vld [vmem:[#allocation7 + $0x28] sm:$0xf]  ;;  %v160_v17 = vld [vmem:[#allocation2 + $0x8] sm:$0xff] }
  0x72   :  { %3277 = vmatpush1.bf16.msra.mxu0 %v4284_v6  ;;  %v4292_v13 = vld [vmem:[#allocation5 + $0x20] sm:$0xf]  ;;  %v3280_v14 = vpack.c.bf16 %v126_v12, %v124_v10  ;;  %v128_v18 = vld [vmem:[#allocation7 + $0x20] sm:$0xf]  ;;  %v337_v20 = vld [vmem:[#allocation2 + $0x18] sm:$0xff]  ;;  %v151_v59 = vsub.s32 0, %v4407_v57 }
  0x73   :  { %2866 = vmatprep.subr.msk.mxu0 %vm168_vm0, %v4286_v7  ;;  %v159_v15 = vld [vmem:[#allocation2] sm:$0xff]  ;;  %3279 = vmatprep.subr.bf16.mxu1 %v3278_v11  ;;  %v336_v19 = vld [vmem:[#allocation2 + $0x10] sm:$0xff]  ;;  %v133_v22 = vld [vmem:[#allocation8 + $0x8] sm:$0xff] }
  0x74   :  { %3281 = vmatpush1.bf16.msra.mxu1 %v3280_v14  ;;  %v499_v21 = vld [vmem:[#allocation2 + $0x20] sm:$0xff]  ;;  %v135_v23 = vld [vmem:[#allocation8 + $0x18] sm:$0xff]  ;;  %v500_v24 = vld [vmem:[#allocation2 + $0x28] sm:$0xff] }
  0x75   :  { %2870 = vmatprep.subr.msk.mxu1 %vm168_vm0, %v129_v16  ;;  %v4331_v25 = vpack.c.bf16 %v135_v23, %v133_v22  ;;  %v132_v26 = vld [vmem:[#allocation8] sm:$0xff]  ;;  %v134_v27 = vld [vmem:[#allocation8 + $0x10] sm:$0xff]  ;;  %v137_v28 = vld [vmem:[#allocation8 + $0x28] sm:$0xff] }
  0x76   :  { %2867 = vmatpush1.msk.msra.mxu0 %vm168_vm0, %v4292_v13  ;;  %v139_v29 = vld [vmem:[#allocation8 + $0x38] sm:$0xff]  ;;  %v662_v30 = vld [vmem:[#allocation2 + $0x30] sm:$0xff]  ;;  %v4341_v31 = vpack.c.bf16 %v134_v27, %v132_v26  ;;  %v136_v33 = vld [vmem:[#allocation8 + $0x20] sm:$0xff] }
  0x77   :  { %2868 = vmatmul.mubr.msk.f32.vlgmr.msra.gmra.mrb[0].mxu0 %vm161_vm1, %v159_v15  ;;  %3283 = vmatprep.subr.bf16.mxu0 %v4282_v4  ;;  %v4344_v32 = vpack.c.bf16 %v139_v29, %v137_v28  ;;  %v138_v34 = vld [vmem:[#allocation8 + $0x30] sm:$0xff]  ;;  %v141_v35 = vld [vmem:[#allocation8 + $0x48] sm:$0xff]  ;;  %v143_v36 = vld [vmem:[#allocation8 + $0x58] sm:$0xff] }
  0x78   :  { %3285 = vmatpush1.bf16.msra.mxu0 %v4284_v6  ;;  %245 = vmatprep.mubr.f32.mxu0 %v4139_v0  ;;  %v663_v37 = vld [vmem:[#allocation2 + $0x38] sm:$0xff]  ;;  %v4354_v38 = vpack.c.bf16 %v138_v34, %v136_v33  ;;  %v4357_v39 = vpack.c.bf16 %v143_v36, %v141_v35  ;;  %v140_v40 = vld [vmem:[#allocation8 + $0x40] sm:$0xff]  ;;  %v142_v41 = vld [vmem:[#allocation8 + $0x50] sm:$0xff] }
  0x79   :  { %2874 = vmatprep.subr.msk.mxu0 %vm168_vm0, %v4286_v7  ;;  %2871 = vmatpush1.msk.msra.mxu1 %vm168_vm0, %v128_v18  ;;  %v145_v42 = vld [vmem:[#allocation8 + $0x68] sm:$0xff]  ;;  %v147_v43 = vld [vmem:[#allocation8 + $0x78] sm:$0xff]  ;;  %v4366_v44 = vpack.c.bf16 %v142_v41, %v140_v40  ;;  %v144_v46 = vld [vmem:[#allocation8 + $0x60] sm:$0xff] }
  0x7a   :  { %2872 = vmatmul.mubr.msk.f32.vlgmr.msra.gmra.mrb[0].mxu1 %vm161_vm1, %v159_v15  ;;  %3287 = vmatprep.subr.bf16.mxu1 %v3278_v11  ;;  %v4370_v45 = vpack.c.bf16 %v147_v43, %v145_v42  ;;  %v146_v47 = vld [vmem:[#allocation8 + $0x70] sm:$0xff]  ;;  %v130_v60 = vld [vmem:[%s4932_s3] sm:$0x3] }
  0x7b   :  { %2869 = vmatmul.mubr.msk.f32.gmra.mrb[2].mxu0 %vm161_vm1, %v160_v17  ;;  %328 = vmatprep.mubr.f32.mxu1 %v4139_v0  ;;  %v4377_v48 = vpack.c.bf16 %v146_v47, %v144_v46  ;;  %v4415_v61 = vrot.slane %v130_v60, %v151_v59 }
  0x7c   :  { %2875 = vmatpush1.msk.msra.mxu0 %vm168_vm0, %v4292_v13  ;;  %408 = vmatprep.mubr.f32.mxu0 %v4139_v0 }
  0x7d   :  { %3295 = vmatprep.subr.bf16.mxu0 %v3278_v11  ;;  %3289 = vmatpush1.bf16.msra.mxu1 %v3280_v14 }
  0x7e   :  { %2873 = vmatmul.mubr.msk.f32.gmra.mrb[2].mxu1 %vm161_vm1, %v160_v17  ;;  %2878 = vmatprep.subr.msk.mxu1 %vm168_vm0, %v129_v16 }
  0x7f   :  { %2876 = vmatmul.mubr.msk.f32.vlgmr.msra.gmra.mrb[4].mxu0 %vm161_vm1, %v336_v19  ;;  %485 = vmatprep.mubr.f32.mxu1 %v4139_v0 }
  0x80   :  { %3297 = vmatpush1.bf16.msra.mxu0 %v3280_v14  ;;  %414 = vmatprep.mubr.f32.mxu0 %v4139_v0 }
  0x81   :  { %2886 = vmatprep.subr.msk.mxu0 %vm168_vm0, %v129_v16  ;;  %2879 = vmatpush1.msk.msra.mxu1 %vm168_vm0, %v128_v18 }
  0x82   :  { %2880 = vmatmul.mubr.msk.f32.vlgmr.msra.gmra.mrb[4].mxu1 %vm161_vm1, %v336_v19  ;;  %3291 = vmatprep.subr.bf16.mxu1 %v4282_v4 }
  0x83   :  { %2877 = vmatmul.mubr.msk.f32.gmra.mrb[6].mxu0 %vm161_vm1, %v337_v20  ;;  %491 = vmatprep.mubr.f32.mxu1 %v4139_v0 }
  0x84   :  { %2887 = vmatpush1.msk.msra.mxu0 %vm168_vm0, %v128_v18  ;;  %648 = vmatprep.mubr.f32.mxu0 %v4139_v0 }
  0x85   :  { %3303 = vmatprep.subr.bf16.mxu0 %v3278_v11  ;;  %3293 = vmatpush1.bf16.msra.mxu1 %v4284_v6 }
  0x86   :  { %2881 = vmatmul.mubr.msk.f32.gmra.mrb[6].mxu1 %vm161_vm1, %v337_v20  ;;  %2882 = vmatprep.subr.msk.mxu1 %vm168_vm0, %v4286_v7 }
  0x87   :  { %2888 = vmatmul.mubr.msk.f32.vlgmr.msra.gmra.mrb[4].mxu0 %vm161_vm1, %v499_v21  ;;  %571 = vmatprep.mubr.f32.mxu1 %v4139_v0 }
  0x88   :  { %3305 = vmatpush1.bf16.msra.mxu0 %v3280_v14  ;;  %654 = vmatprep.mubr.f32.mxu0 %v4139_v0  ;;  %v4423_v14 = vld [vmem:[%s4933_s4] ss:$0 sm:$0xff]  ;;  %s4140_s4 = smov 64  }
  0x89   :  { %2894 = vmatprep.subr.msk.mxu0 %vm168_vm0, %v129_v16  ;;  %2883 = vmatpush1.msk.msra.mxu1 %vm168_vm0, %v4292_v13 }
  0x8a   :  { %2884 = vmatmul.mubr.msk.f32.vlgmr.msra.gmra.mrb[4].mxu1 %vm161_vm1, %v499_v21  ;;  %3299 = vmatprep.subr.bf16.mxu1 %v4282_v4 }
  0x8b   :  { %2889 = vmatmul.mubr.msk.f32.gmra.mrb[6].mxu0 %vm161_vm1, %v500_v24  ;;  %577 = vmatprep.mubr.f32.mxu1 %v4139_v0 }
  0x8c   :  { %2895 = vmatpush1.msk.msra.mxu0 %vm168_vm0, %v128_v18  ;;  %811 = vmatprep.mubr.f32.mxu0 %v4139_v0 }
  0x8d   :  { %3307 = vmatprep.subr.bf16.mxu0 %v4331_v25  ;;  %3301 = vmatpush1.bf16.msra.mxu1 %v4284_v6 }
  0x8e   :  { %2885 = vmatmul.mubr.msk.f32.gmra.mrb[6].mxu1 %vm161_vm1, %v500_v24  ;;  %2890 = vmatprep.subr.msk.mxu1 %vm168_vm0, %v4286_v7 }
  0x8f   :  { %2896 = vmatmul.mubr.msk.f32.vlgmr.msra.gmra.mrb[0].mxu0 %vm161_vm1, %v662_v30  ;;  %734 = vmatprep.mubr.f32.mxu1 %v4139_v0 }
  0x90   :  { %3309 = vmatpush1.bf16.msra.mxu0 %v4341_v31  ;;  %817 = vmatprep.mubr.f32.mxu0 %v4139_v0 }
  0x91   :  { %3311 = vmatprep.subr.bf16.mxu0 %v4344_v32  ;;  %2891 = vmatpush1.msk.msra.mxu1 %vm168_vm0, %v4292_v13  ;;  %v155_v13 = vsub.s32 1, %v4407_v57 }
  0x92   :  { %2892 = vmatmul.mubr.msk.f32.vlgmr.msra.gmra.mrb[0].mxu1 %vm161_vm1, %v662_v30  ;;  %3323 = vmatprep.subr.bf16.mxu1 %v4331_v25 }
  0x93   :  { %2897 = vmatmul.mubr.msk.f32.gmra.mrb[2].mxu0 %vm161_vm1, %v663_v37  ;;  %740 = vmatprep.mubr.f32.mxu1 %v4139_v0  ;;  %v4427_v15 = vrot.slane %v130_v60, %v155_v13 }
  0x94   :  { %3313 = vmatpush1.bf16.msra.mxu0 %v4354_v38  ;;  %914 = vmatprep.mubr.f32.mxu0 %v4139_v0 }
  0x95   :  { %3315 = vmatprep.subr.bf16.mxu0 %v4357_v39  ;;  %3325 = vmatpush1.bf16.msra.mxu1 %v4341_v31 }
  0x96   :  { %2893 = vmatmul.mubr.msk.f32.gmra.mrb[2].mxu1 %vm161_vm1, %v663_v37  ;;  %3327 = vmatprep.subr.bf16.mxu1 %v4344_v32 }
  0x97   :  { %1039 = vmatprep.mubr.f32.mxu1 %v4139_v0 }
  0x98   :  { %3317 = vmatpush1.bf16.msra.mxu0 %v4366_v44 }
  0x99   :  { %3319 = vmatprep.subr.bf16.mxu0 %v4370_v45  ;;  %3329 = vmatpush1.bf16.msra.mxu1 %v4354_v38 }
  0x9a   :  { %3331 = vmatprep.subr.bf16.mxu1 %v4357_v39 }
  0x9c   :  { %3321 = vmatpush1.bf16.msra.mxu0 %v4377_v48 }
  0x9d   :  { %3333 = vmatpush1.bf16.msra.mxu1 %v4366_v44  ;;  %3339 = vmatprep.subr.bf16.mxu0 %v4331_v25 }
  0x9e   :  { %3335 = vmatprep.subr.bf16.mxu1 %v4370_v45 }
  0x9f   :  { %915 = vmatmul.mubr.f32.vlgmr.msra.gmra.mrb[8].mxu0 %v4139_v0 }
  0xa0   :  { %920 = vmatprep.mubr.f32.mxu0 %v4139_v0  ;;  %3341 = vmatpush1.bf16.msra.mxu0 %v4341_v31 }
  0xa1   :  { %3337 = vmatpush1.bf16.msra.mxu1 %v4377_v48  ;;  %3343 = vmatprep.subr.bf16.mxu0 %v4344_v32 }
  0xa2   :  { %3355 = vmatprep.subr.bf16.mxu1 %v4331_v25 }
  0xa3   :  { %921 = vmatmul.mubr.f32.gmra.mrb[10].mxu0 %v4139_v0 }
  0xa4   :  { %3345 = vmatpush1.bf16.msra.mxu0 %v4354_v38  ;;  %1164 = vmatprep.mubr.f32.mxu0 %v4139_v0 }
  0xa5   :  { %3347 = vmatprep.subr.bf16.mxu0 %v4357_v39 }
  0xa8   :  { %3349 = vmatpush1.bf16.msra.mxu0 %v4366_v44 }
  0xa9   :  { %3351 = vmatprep.subr.bf16.mxu0 %v4370_v45 }
  0xac   :  { %3353 = vmatpush1.bf16.msra.mxu0 %v4377_v48 }
 0x15a   :  { %v4399_v49 = vpop.f32.mrb[4].mxu0 }
 0x15b   :  { %v4401_v50 = vpop.f32.mrb[5].mxu0 }
 0x15d   :  { %v4435_v28 = vpop.f32.mrb[4].mxu1 }
 0x15e   :  { %v4403_v51 = vpop.f32.mrb[6].mxu0  ;;  %v4437_v29 = vpop.f32.mrb[5].mxu1 }
 0x15f   :  { %v4405_v52 = vpop.f32.mrb[7].mxu0 }
 0x161   :  { %v4439_v30 = vpop.f32.mrb[6].mxu1 }
 0x162   :  { %v813_v53 = vpop.f32.mrb[0].mxu0  ;;  %v4441_v34 = vpop.f32.mrb[7].mxu1 }
 0x163   :  { %v815_v55 = vpop.f32.mrb[1].mxu0  ;;  %v3754_v62 = vadd.f32 %v813_v53, %v4415_v61 }
 0x164   :  { %v3755_v18 = vadd.f32 %v815_v55, %v4427_v15 }
 0x165   :  { %v4443_v36 = vpop.f32.mrb[0].mxu1 }
 0x166   :  { %v819_v56 = vpop.f32.mrb[2].mxu0  ;;  %v4445_v41 = vpop.f32.mrb[1].mxu1 }
 0x167   :  { %v821_v58 = vpop.f32.mrb[3].mxu0  ;;  %v3756_v3 = vadd.f32 %v819_v56, %v4415_v61 }
 0x168   :  { %v3757_v23 = vadd.f32 %v821_v58, %v4427_v15 }
 0x169   :  { %v4447_v42 = vpop.f32.mrb[2].mxu1 }
 0x16a   :  { %v4449_v47 = vpop.f32.mrb[3].mxu1 }
 0x172   :  { %v916_v63 = vpop.f32.mrb[8].mxu0 }
 0x173   :  { %v927_v1 = vadd.f32 %v3754_v62, %v916_v63  ;;  %v918_v2 = vpop.f32.mrb[9].mxu0 }
 0x174   :  { %v941_v16 = vadd.f32 %v4423_v14, %v918_v2 }
 0x175   :  { %v2899_v4 = vmul.f32 -1.442695, %v927_v1  ;;  %v3764_v1 = vadd.f32 %v4403_v51, %v4415_v61 }
 0x176   :  { %v922_v5 = vpop.f32.mrb[10].mxu0 }
 0x177   :  { %3835 = vpow2.f32 %v2899_v4  ;;  %v928_v6 = vadd.f32 %v3756_v3, %v922_v5  ;;  %v924_v7 = vpop.f32.mrb[11].mxu0 }
 0x178   :  { %v942_v21 = vadd.f32 %v4423_v14, %v924_v7  ;;  %v3763_v7 = vadd.f32 %v4401_v50, %v4427_v15 }
 0x179   :  { %v2900_v8 = vmul.f32 -1.442695, %v928_v6 }
 0x17b   :  { %3837 = vpow2.f32 %v2900_v8 }
 0x181   :  { %v3836_v9 = vpop.eup %3835 }
 0x182   :  { %v935_v10 = vadd.f32 1.0, %v3836_v9 }
 0x184   :  { %3839 = vrcp.f32 %v935_v10 }
 0x185   :  { %v3838_v11 = vpop.eup %3837 }
 0x186   :  { %v936_v12 = vadd.f32 1.0, %v3838_v11  ;;  %v3765_v11 = vadd.f32 %v4405_v52, %v4427_v15 }
 0x188   :  { %3841 = vrcp.f32 %v936_v12 }
 0x18e   :  { %v3840_v17 = vpop.eup %3839 }
 0x18f   :  { %v943_v19 = vmul.f32 %v3840_v17, %v941_v16  ;;  %v949_v33 = vsub.f32 1.0, %v3840_v17  ;;  %v961_v40 = vmul.f32 0.0, %v3840_v17  ;;  %v1341_v17 = vld [vmem:[#allocation10 + $0x8] sm:$0xff] }
 0x191   :  { %v945_v20 = vadd.f32 %v3755_v18, %v943_v19  ;;  %v1344_v18 = vld [vmem:[#allocation10 + $0x20] sm:$0xff] }
 0x192   :  { %v3842_v22 = vpop.eup %3841  ;;  %v4480_v19 = vpack.c.bf16 %v1344_v18, %v1341_v17 }
 0x193   :  { %3843 = vtanh.f32 %v945_v20  ;;  %v944_v24 = vmul.f32 %v3842_v22, %v942_v21  ;;  %v950_v43 = vsub.f32 1.0, %v3842_v22  ;;  %v962_v54 = vmul.f32 0.0, %v3842_v22 }
 0x194   :  { %3371 = vmatprep.subr.bf16.mxu0 %v4480_v19 }
 0x195   :  { %v946_v25 = vadd.f32 %v3757_v23, %v944_v24 }
 0x197   :  { %3845 = vtanh.f32 %v946_v25 }
 0x19d   :  { %v3844_v26 = vpop.eup %3843 }
 0x19e   :  { %953 = vrot.lane.b32.xlu0 %v3844_v26, %s4140_s4 }
 0x1a1   :  { %v3846_v27 = vpop.eup %3845 }
 0x1a2   :  { %955 = vrot.lane.b32.xlu0 %v3846_v27, %s4140_s4 }
 0x210   :  { %v954_v35 = vpop.permute.xlu0 %953 }
 0x211   :  { %v959_v37 = vmul.f32 %v954_v35, %v949_v33 }
 0x213   :  { %v963_v46 = vadd.f32 %v961_v40, %v959_v37  ;;  %v1340_v37 = vld [vmem:[#allocation10] sm:$0xff]  ;;  %v1343_v40 = vld [vmem:[#allocation10 + $0x18] sm:$0xff] }
 0x214   :  { %v956_v53 = vpop.permute.xlu0 %955 }
 0x215   :  { %v960_v55 = vmul.f32 %v956_v53, %v950_v43  ;;  %967 = vrot.lane.b32.xlu1 %v963_v46, %s4140_s4  ;;  %v1347_v43 = vld [vmem:[#allocation10 + $0x38] sm:$0xff]  ;;  %v1350_v53 = vld [vmem:[#allocation10 + $0x50] sm:$0xff] }
 0x217   :  { %v964_v56 = vadd.f32 %v962_v54, %v960_v55  ;;  %v4495_v54 = vpack.c.bf16 %v1350_v53, %v1347_v43  ;;  %v1346_v55 = vld [vmem:[#allocation10 + $0x30] sm:$0xff] }
 0x219   :  { %969 = vrot.lane.b32.xlu1 %v964_v56, %s4140_s4 }
 0x287   :  { %v4453_v58 = vpop.permute.xlu1 %967 }
 0x288   :  { %2901 = vmatmul.mubr.msk.f32.vlgmr.msra.gmra.mrb[8].mxu1 %vm846_vm2, %v4453_v58 }
 0x289   :  { %1045 = vmatprep.mubr.f32.mxu1 %v4139_v0  ;;  %3357 = vmatpush1.bf16.msra.mxu1 %v4341_v31  ;;  %v3762_v31 = vadd.f32 %v4399_v49, %v4415_v61 }
 0x28a   :  { %3359 = vmatprep.subr.bf16.mxu1 %v4344_v32 }
 0x28b   :  { %v4460_v60 = vpop.permute.xlu1 %969 }
 0x28c   :  { %2902 = vmatmul.mubr.msk.f32.gmra.mrb[10].mxu1 %vm846_vm2, %v4460_v60 }
 0x28d   :  { %3361 = vmatpush1.bf16.msra.mxu1 %v4354_v38  ;;  %1289 = vmatprep.mubr.f32.mxu1 %v4139_v0 }
 0x28e   :  { %3363 = vmatprep.subr.bf16.mxu1 %v4357_v39 }
 0x291   :  { %3365 = vmatpush1.bf16.msra.mxu1 %v4366_v44 }
 0x292   :  { %3367 = vmatprep.subr.bf16.mxu1 %v4370_v45 }
 0x295   :  { %3369 = vmatpush1.bf16.msra.mxu1 %v4377_v48 }
 0x35b   :  { %v1041_v32 = vpop.f32.mrb[8].mxu1 }
 0x35c   :  { %v1052_v62 = vadd.f32 %v3762_v31, %v1041_v32  ;;  %v1043_v63 = vpop.f32.mrb[9].mxu1  ;;  %v1349_v31 = vld [vmem:[#allocation10 + $0x48] sm:$0xff] }
 0x35d   :  { %v1066_v49 = vadd.f32 %v4423_v14, %v1043_v63  ;;  %v1353_v32 = vld [vmem:[#allocation10 + $0x68] sm:$0xff]  ;;  %v4503_v63 = vpack.c.bf16 %v1349_v31, %v1346_v55 }
 0x35e   :  { %v2903_v38 = vmul.f32 -1.442695, %v1052_v62  ;;  %v1356_v62 = vld [vmem:[#allocation10 + $0x80] sm:$0xff] }
 0x35f   :  { %v1047_v2 = vpop.f32.mrb[10].mxu1 }
 0x360   :  { %3847 = vpow2.f32 %v2903_v38  ;;  %v1053_v3 = vadd.f32 %v3764_v1, %v1047_v2  ;;  %v1049_v39 = vpop.f32.mrb[11].mxu1  ;;  %v4506_v1 = vpack.c.bf16 %v1356_v62, %v1353_v32  ;;  %v1352_v38 = vld [vmem:[#allocation10 + $0x60] sm:$0xff]  ;;  %v1355_v2 = vld [vmem:[#allocation10 + $0x78] sm:$0xff] }
 0x361   :  { %v1067_v9 = vadd.f32 %v4423_v14, %v1049_v39  ;;  %v1359_v39 = vld [vmem:[#allocation10 + $0x98] sm:$0xff] }
 0x362   :  { %v2904_v4 = vmul.f32 -1.442695, %v1053_v3 }
 0x364   :  { %3849 = vpow2.f32 %v2904_v4  ;;  %v1362_v4 = vld [vmem:[#allocation10 + $0xb0] sm:$0xff] }
 0x36a   :  { %v3848_v44 = vpop.eup %3847 }
 0x36b   :  { %v1060_v45 = vadd.f32 1.0, %v3848_v44  ;;  %v4513_v44 = vpack.c.bf16 %v1355_v2, %v1352_v38 }
 0x36d   :  { %3851 = vrcp.f32 %v1060_v45  ;;  %v4517_v45 = vpack.c.bf16 %v1362_v4, %v1359_v39 }
 0x36e   :  { %v3850_v48 = vpop.eup %3849 }
 0x36f   :  { %v1061_v5 = vadd.f32 1.0, %v3850_v48  ;;  %v1358_v48 = vld [vmem:[#allocation10 + $0x90] sm:$0xff] }
 0x371   :  { %3853 = vrcp.f32 %v1061_v5  ;;  %v1361_v5 = vld [vmem:[#allocation10 + $0xa8] sm:$0xff] }
 0x377   :  { %v3852_v6 = vpop.eup %3851 }
 0x378   :  { %v1068_v51 = vmul.f32 %v3852_v6, %v1066_v49  ;;  %v1074_v21 = vsub.f32 1.0, %v3852_v6  ;;  %v1086_v23 = vmul.f32 %v3852_v6, %v963_v46  ;;  %v4493_v46 = vpack.c.bf16 %v1343_v40, %v1340_v37  ;;  %v1342_v37 = vld [vmem:[#allocation10 + $0x10] sm:$0xff]  ;;  %v1345_v40 = vld [vmem:[#allocation10 + $0x28] sm:$0xff] }
 0x379   :  { %v4520_v49 = vpack.c.bf16 %v1361_v5, %v1358_v48  ;;  %v574_v6 = vadd.f32 %v4435_v28, %v4415_v61  ;;  %v4563_v43 = vpack.c.bf16 %v1345_v40, %v1342_v37  ;;  %v1348_v5 = vld [vmem:[#allocation10 + $0x40] sm:$0xff] }
 0x37a   :  { %v1070_v8 = vadd.f32 %v3763_v7, %v1068_v51 }
 0x37b   :  { %v3854_v10 = vpop.eup %3853  ;;  %3387 = vmatprep.subr.bf16.mxu1 %v4563_v43 }
 0x37c   :  { %3855 = vtanh.f32 %v1070_v8  ;;  %v1069_v12 = vmul.f32 %v3854_v10, %v1067_v9  ;;  %v1075_v25 = vsub.f32 1.0, %v3854_v10  ;;  %v1087_v27 = vmul.f32 %v3854_v10, %v964_v56 }
 0x37d   :  { %v580_v9 = vadd.f32 %v4439_v30, %v4415_v61 }
 0x37e   :  { %v1071_v16 = vadd.f32 %v3765_v11, %v1069_v12 }
 0x380   :  { %3857 = vtanh.f32 %v1071_v16 }
 0x386   :  { %v3856_v20 = vpop.eup %3855 }
 0x387   :  { %1078 = vrot.lane.b32.xlu0 %v3856_v20, %s4140_s4 }
 0x38a   :  { %v3858_v50 = vpop.eup %3857 }
 0x38b   :  { %1080 = vrot.lane.b32.xlu1 %v3858_v50, %s4140_s4 }
 0x3f9   :  { %v1079_v22 = vpop.permute.xlu0 %1078 }
 0x3fa   :  { %v1084_v52 = vmul.f32 %v1079_v22, %v1074_v21  ;;  %v576_v22 = vadd.f32 %v4437_v29, %v4427_v15 }
 0x3fc   :  { %v4485_v24 = vadd.f32 %v1086_v23, %v1084_v52 }
 0x3fd   :  { %v1081_v26 = vpop.permute.xlu1 %1080 }
 0x3fe   :  { %v1085_v33 = vmul.f32 %v1081_v26, %v1075_v25  ;;  %1092 = vrot.lane.b32.xlu0 %v4485_v24, %s4140_s4  ;;  %v582_v26 = vadd.f32 %v4441_v34, %v4427_v15 }
 0x400   :  { %v4489_v35 = vadd.f32 %v1087_v27, %v1085_v33 }
 0x402   :  { %1094 = vrot.lane.b32.xlu1 %v4489_v35, %s4140_s4 }
 0x470   :  { %v4497_v56 = vpop.permute.xlu0 %1092 }
 0x471   :  { %2905 = vmatmul.mubr.msk.f32.vlgmr.msra.gmra.mrb[12].mxu0 %vm846_vm2, %v4497_v56 }
 0x472   :  { %3373 = vmatpush1.bf16.msra.mxu0 %v4493_v46  ;;  %1170 = vmatprep.mubr.f32.mxu0 %v4139_v0 }
 0x473   :  { %3375 = vmatprep.subr.bf16.mxu0 %v4495_v54 }
 0x474   :  { %v4508_v3 = vpop.permute.xlu1 %1094 }
 0x475   :  { %2906 = vmatmul.mubr.msk.f32.gmra.mrb[14].mxu0 %vm846_vm2, %v4508_v3 }
 0x476   :  { %3377 = vmatpush1.bf16.msra.mxu0 %v4503_v63  ;;  %1494 = vmatprep.mubr.f32.mxu0 %v4139_v0 }
 0x477   :  { %3379 = vmatprep.subr.bf16.mxu0 %v4506_v1 }
 0x47a   :  { %3381 = vmatpush1.bf16.msra.mxu0 %v4513_v44 }
 0x47b   :  { %3383 = vmatprep.subr.bf16.mxu0 %v4517_v45 }
 0x47e   :  { %3385 = vmatpush1.bf16.msra.mxu0 %v4520_v49 }
 0x47f   :  { %3403 = vmatprep.subr.bf16.mxu0 %v4480_v19 }
 0x481   :  { %2913 = vmatmul.mubr.msk.f32.vlgmr.msra.gmra.mrb[16].mxu0 %vm846_vm2, %v4453_v58 }
 0x482   :  { %3405 = vmatpush1.bf16.msra.mxu0 %v4493_v46  ;;  %1500 = vmatprep.mubr.f32.mxu0 %v4139_v0 }
 0x483   :  { %3407 = vmatprep.subr.bf16.mxu0 %v4495_v54 }
 0x485   :  { %2914 = vmatmul.mubr.msk.f32.gmra.mrb[18].mxu0 %vm846_vm2, %v4460_v60 }
 0x486   :  { %3409 = vmatpush1.bf16.msra.mxu0 %v4503_v63  ;;  %1646 = vmatprep.mubr.f32.mxu0 %v4139_v0 }
 0x487   :  { %3411 = vmatprep.subr.bf16.mxu0 %v4506_v1 }
 0x48a   :  { %3413 = vmatpush1.bf16.msra.mxu0 %v4513_v44 }
 0x48b   :  { %3415 = vmatprep.subr.bf16.mxu0 %v4517_v45 }
 0x48e   :  { %3417 = vmatpush1.bf16.msra.mxu0 %v4520_v49 }
 0x48f   :  { %3435 = vmatprep.subr.bf16.mxu0 %v4480_v19 }
 0x491   :  { %2917 = vmatmul.mubr.msk.f32.vlgmr.msra.gmra.mrb[20].mxu0 %vm846_vm2, %v4497_v56 }
 0x492   :  { %1652 = vmatprep.mubr.f32.mxu0 %v4139_v0  ;;  %3437 = vmatpush1.bf16.msra.mxu0 %v4493_v46 }
 0x493   :  { %3439 = vmatprep.subr.bf16.mxu0 %v4495_v54 }
 0x495   :  { %2918 = vmatmul.mubr.msk.f32.gmra.mrb[22].mxu0 %vm846_vm2, %v4508_v3 }
 0x496   :  { %3441 = vmatpush1.bf16.msra.mxu0 %v4503_v63  ;;  %1798 = vmatprep.mubr.f32.mxu0 %v4139_v0 }
 0x497   :  { %3443 = vmatprep.subr.bf16.mxu0 %v4506_v1 }
 0x49a   :  { %3445 = vmatpush1.bf16.msra.mxu0 %v4513_v44 }
 0x49b   :  { %3447 = vmatprep.subr.bf16.mxu0 %v4517_v45 }
 0x49e   :  { %3449 = vmatpush1.bf16.msra.mxu0 %v4520_v49 }
 0x49f   :  { %3467 = vmatprep.subr.bf16.mxu0 %v4480_v19 }
 0x544   :  { %v1166_v7 = vpop.f32.mrb[12].mxu0 }
 0x545   :  { %v1177_v51 = vadd.f32 %v1166_v7, %v574_v6  ;;  %v1168_v8 = vpop.f32.mrb[13].mxu0  ;;  %v1351_v6 = vld [vmem:[#allocation10 + $0x58] sm:$0xff] }
 0x546   :  { %v1191_v28 = vadd.f32 %v4423_v14, %v1168_v8  ;;  %v3390_v7 = vpack.c.bf16 %v1351_v6, %v1348_v5  ;;  %v1357_v8 = vld [vmem:[#allocation10 + $0x88] sm:$0xff]  ;;  %v1366_v6 = vld [vmem:[#allocation11] sm:$0xff] }
 0x547   :  { %v2907_v10 = vmul.f32 -1.442695, %v1177_v51  ;;  %v1354_v51 = vld [vmem:[#allocation10 + $0x70] sm:$0xff] }
 0x548   :  { %v1172_v11 = vpop.f32.mrb[14].mxu0 }
 0x549   :  { %3859 = vpow2.f32 %v2907_v10  ;;  %v1178_v12 = vadd.f32 %v1172_v11, %v580_v9  ;;  %v1174_v16 = vpop.f32.mrb[15].mxu0  ;;  %v1360_v10 = vld [vmem:[#allocation10 + $0xa0] sm:$0xff]  ;;  %v1363_v11 = vld [vmem:[#allocation10 + $0xb8] sm:$0xff] }
 0x54a   :  { %v1192_v52 = vadd.f32 %v4423_v14, %v1174_v16 }
 0x54b   :  { %v2908_v17 = vmul.f32 -1.442695, %v1178_v12  ;;  %v3398_v12 = vpack.c.bf16 %v1363_v11, %v1360_v10  ;;  %v1382_v11 = vld [vmem:[#allocation11 + $0x80] sm:$0xff] }
 0x54d   :  { %3861 = vpow2.f32 %v2908_v17 }
 0x553   :  { %v3860_v18 = vpop.eup %3859 }
 0x554   :  { %v1185_v20 = vadd.f32 1.0, %v3860_v18 }
 0x556   :  { %3863 = vrcp.f32 %v1185_v20 }
 0x557   :  { %v3862_v19 = vpop.eup %3861 }
 0x558   :  { %v1186_v50 = vadd.f32 1.0, %v3862_v19 }
 0x55a   :  { %3865 = vrcp.f32 %v1186_v50 }
 0x560   :  { %v3864_v21 = vpop.eup %3863 }
 0x561   :  { %v1193_v30 = vmul.f32 %v3864_v21, %v1191_v28  ;;  %v1199_v55 = vsub.f32 1.0, %v3864_v21  ;;  %v1211_v34 = vmul.f32 %v3864_v21, %v4485_v24 }
 0x563   :  { %v1195_v23 = vadd.f32 %v1193_v30, %v576_v22 }
 0x564   :  { %v3866_v25 = vpop.eup %3865 }
 0x565   :  { %3867 = vtanh.f32 %v1195_v23  ;;  %v1194_v27 = vmul.f32 %v3866_v25, %v1192_v52  ;;  %v1200_v38 = vsub.f32 1.0, %v3866_v25  ;;  %v1212_v39 = vmul.f32 %v3866_v25, %v4489_v35 }
 0x566   :  { %v3394_v35 = vpack.c.bf16 %v1357_v8, %v1354_v51  ;;  %v745_v23 = vadd.f32 %v4449_v47, %v4427_v15 }
 0x567   :  { %v1196_v33 = vadd.f32 %v1194_v27, %v582_v26  ;;  %v1367_v27 = vld [vmem:[#allocation11 + $0x8] sm:$0xff] }
 0x569   :  { %3869 = vtanh.f32 %v1196_v33  ;;  %v1370_v33 = vld [vmem:[#allocation11 + $0x20] sm:$0xff] }
 0x56a   :  { %v4627_v37 = vpack.c.bf16 %v1370_v33, %v1367_v27  ;;  %v1397_v27 = vld [vmem:[#allocation11 + $0xf8] sm:$0xff] }
 0x56f   :  { %v3868_v53 = vpop.eup %3867 }
 0x570   :  { %1203 = vrot.lane.b32.xlu0 %v3868_v53, %s4140_s4 }
 0x573   :  { %v3870_v29 = vpop.eup %3869 }
 0x574   :  { %1205 = vrot.lane.b32.xlu1 %v3870_v29, %s4140_s4 }
 0x5e2   :  { %v1204_v31 = vpop.permute.xlu0 %1203 }
 0x5e3   :  { %v1209_v32 = vmul.f32 %v1204_v31, %v1199_v55 }
 0x5e5   :  { %v4569_v62 = vadd.f32 %v1211_v34, %v1209_v32 }
 0x5e6   :  { %v1206_v2 = vpop.permute.xlu1 %1205 }
 0x5e7   :  { %v1210_v4 = vmul.f32 %v1206_v2, %v1200_v38  ;;  %1217 = vrot.lane.b32.xlu0 %v4569_v62, %s4140_s4 }
 0x5e9   :  { %v4574_v48 = vadd.f32 %v1212_v39, %v1210_v4  ;;  %v1368_v39 = vld [vmem:[#allocation11 + $0x10] sm:$0xff]  ;;  %v1371_v4 = vld [vmem:[#allocation11 + $0x28] sm:$0xff] }
 0x5ea   :  { %v4640_v5 = vpack.c.bf16 %v1371_v4, %v1368_v39 }
 0x5eb   :  { %1219 = vrot.lane.b32.xlu1 %v4574_v48, %s4140_s4 }
 0x659   :  { %v1218_v24 = vpop.permute.xlu0 %1217 }
 0x65a   :  { %2909 = vmatmul.mubr.msk.f32.vlgmr.msra.gmra.mrb[12].mxu1 %vm846_vm2, %v1218_v24  ;;  %2921 = vmatmul.mubr.msk.f32.vlgmr.msra.gmra.mrb[24].mxu0 %vm846_vm2, %v1218_v24 }
 0x65b   :  { %3389 = vmatpush3.bf16.msra.mxu1 %v4563_v43  ;;  %1295 = vmatprep.mubr.f32.mxu1 %v4139_v0 }
 0x65c   :  { %3391 = vmatprep.subr.bf16.mxu1 %v3390_v7  ;;  %1804 = vmatprep.mubr.f32.mxu0 %v4139_v0 }
 0x65d   :  { %v1220_v9 = vpop.permute.xlu1 %1219  ;;  %3469 = vmatpush1.bf16.msra.mxu0 %v4493_v46 }
 0x65e   :  { %2910 = vmatmul.mubr.msk.f32.gmra.mrb[14].mxu1 %vm846_vm2, %v1220_v9  ;;  %2922 = vmatmul.mubr.msk.f32.gmra.mrb[26].mxu0 %vm846_vm2, %v1220_v9 }
 0x65f   :  { %3393 = vmatpush3.bf16.msra.mxu1 %v3390_v7  ;;  %3074 = vmatprep.mubr.msk.f32.mxu1 %vm846_vm2, %v4453_v58  ;;  %v737_v58 = vadd.f32 %v4443_v36, %v4415_v61 }
 0x660   :  { %3395 = vmatprep.subr.bf16.mxu1 %v3394_v35  ;;  %3471 = vmatprep.subr.bf16.mxu0 %v4495_v54 }
 0x661   :  { %3473 = vmatpush1.bf16.msra.mxu0 %v4503_v63  ;;  %1960 = vmatprep.mubr.f32.mxu0 %v4139_v0 }
 0x662   :  { %3475 = vmatprep.subr.bf16.mxu0 %v4506_v1 }
 0x663   :  { %3397 = vmatpush3.bf16.msra.mxu1 %v3394_v35 }
 0x664   :  { %3399 = vmatprep.subr.bf16.mxu1 %v3398_v12 }
 0x665   :  { %3477 = vmatpush1.bf16.msra.mxu0 %v4513_v44 }
 0x666   :  { %3479 = vmatprep.subr.bf16.mxu0 %v4517_v45 }
 0x667   :  { %3401 = vmatpush3.bf16.msra.mxu1 %v3398_v12 }
 0x668   :  { %3419 = vmatprep.subr.bf16.mxu1 %v4563_v43 }
 0x669   :  { %3481 = vmatpush1.bf16.msra.mxu0 %v4520_v49 }
 0x66a   :  { %3075 = vmatmul.mubr.msk.f32.vlgmr.msra.gmra.mrb[16].mxu1 %vm846_vm2, %v4460_v60  ;;  %3499 = vmatprep.subr.bf16.mxu0 %v4627_v37 }
 0x66b   :  { %3421 = vmatpush3.bf16.msra.mxu1 %v4563_v43  ;;  %3093 = vmatprep.mubr.msk.f32.mxu1 %vm846_vm2, %v4497_v56  ;;  %v743_v56 = vadd.f32 %v4447_v42, %v4415_v61  ;;  %v739_v42 = vadd.f32 %v4445_v41, %v4427_v15 }
 0x66c   :  { %3423 = vmatprep.subr.bf16.mxu1 %v3390_v7 }
 0x66f   :  { %3425 = vmatpush3.bf16.msra.mxu1 %v3390_v7 }
 0x670   :  { %3427 = vmatprep.subr.bf16.mxu1 %v3394_v35 }
 0x673   :  { %3429 = vmatpush3.bf16.msra.mxu1 %v3394_v35 }
 0x674   :  { %3431 = vmatprep.subr.bf16.mxu1 %v3398_v12 }
 0x677   :  { %3433 = vmatpush3.bf16.msra.mxu1 %v3398_v12 }
 0x678   :  { %3451 = vmatprep.subr.bf16.mxu1 %v4563_v43 }
 0x67a   :  { %3094 = vmatmul.mubr.msk.f32.vlgmr.msra.gmra.mrb[18].mxu1 %vm846_vm2, %v4508_v3 }
 0x67b   :  { %3453 = vmatpush3.bf16.msra.mxu1 %v4563_v43  ;;  %3112 = vmatprep.mubr.msk.f32.mxu1 %vm846_vm2, %v1218_v24  ;;  %v1376_v24 = vld [vmem:[#allocation11 + $0x50] sm:$0xff] }
 0x67c   :  { %3455 = vmatprep.subr.bf16.mxu1 %v3390_v7 }
 0x67f   :  { %3457 = vmatpush3.bf16.msra.mxu1 %v3390_v7 }
 0x680   :  { %3459 = vmatprep.subr.bf16.mxu1 %v3394_v35 }
 0x683   :  { %3461 = vmatpush3.bf16.msra.mxu1 %v3394_v35 }
 0x684   :  { %3463 = vmatprep.subr.bf16.mxu1 %v3398_v12 }
 0x687   :  { %3465 = vmatpush3.bf16.msra.mxu1 %v3398_v12 }
 0x688   :  { %3483 = vmatprep.subr.bf16.mxu1 %v4563_v43 }
 0x68a   :  { %3113 = vmatmul.mubr.msk.f32.vlgmr.msra.gmra.mrb[20].mxu1 %vm846_vm2, %v1220_v9  ;;  %v1379_v9 = vld [vmem:[#allocation11 + $0x68] sm:$0xff] }
 0x68b   :  { %3485 = vmatpush3.bf16.msra.mxu1 %v4563_v43 }
 0x68c   :  { %3487 = vmatprep.subr.bf16.mxu1 %v3390_v7 }
 0x68f   :  { %3489 = vmatpush3.bf16.msra.mxu1 %v3390_v7  ;;  %v1373_v7 = vld [vmem:[#allocation11 + $0x38] sm:$0xff] }
 0x690   :  { %3491 = vmatprep.subr.bf16.mxu1 %v3394_v35  ;;  %v4645_v8 = vpack.c.bf16 %v1376_v24, %v1373_v7  ;;  %v1409_v7 = vld [vmem:[#allocation11 + $0x158] sm:$0xff] }
 0x693   :  { %3493 = vmatpush3.bf16.msra.mxu1 %v3394_v35  ;;  %v1375_v35 = vld [vmem:[#allocation11 + $0x48] sm:$0xff] }
 0x694   :  { %3495 = vmatprep.subr.bf16.mxu1 %v3398_v12 }
 0x697   :  { %3497 = vmatpush3.bf16.msra.mxu1 %v3398_v12  ;;  %v1374_v12 = vld [vmem:[#allocation11 + $0x40] sm:$0xff] }
 0x698   :  { %3531 = vmatprep.subr.bf16.mxu1 %v4640_v5 }
 0x72d   :  { %v1291_v60 = vpop.f32.mrb[12].mxu1 }
 0x72e   :  { %v1302_v46 = vadd.f32 %v1291_v60, %v737_v58  ;;  %v1293_v54 = vpop.f32.mrb[13].mxu1  ;;  %v1377_v58 = vld [vmem:[#allocation11 + $0x58] sm:$0xff] }
 0x72f   :  { %v1316_v19 = vadd.f32 %v4423_v14, %v1293_v54  ;;  %v1378_v54 = vld [vmem:[#allocation11 + $0x60] sm:$0xff] }
 0x730   :  { %v2911_v63 = vmul.f32 -1.442695, %v1302_v46  ;;  %v4654_v46 = vpack.c.bf16 %v1382_v11, %v1379_v9  ;;  %v1407_v9 = vld [vmem:[#allocation11 + $0x148] sm:$0xff] }
 0x731   :  { %v1297_v1 = vpop.f32.mrb[14].mxu1 }
 0x732   :  { %3871 = vpow2.f32 %v2911_v63  ;;  %v1303_v3 = vadd.f32 %v1297_v1, %v743_v56  ;;  %v1299_v44 = vpop.f32.mrb[15].mxu1  ;;  %v1381_v56 = vld [vmem:[#allocation11 + $0x78] sm:$0xff]  ;;  %v4656_v1 = vpack.c.bf16 %v1377_v58, %v1374_v12  ;;  %v1408_v12 = vld [vmem:[#allocation11 + $0x150] sm:$0xff]  ;;  %v1411_v58 = vld [vmem:[#allocation11 + $0x168] sm:$0xff] }
 0x733   :  { %v1317_v21 = vadd.f32 %v4423_v14, %v1299_v44  ;;  %v1385_v63 = vld [vmem:[#allocation11 + $0x98] sm:$0xff]  ;;  %v1388_v44 = vld [vmem:[#allocation11 + $0xb0] sm:$0xff] }
 0x734   :  { %v2912_v45 = vmul.f32 -1.442695, %v1303_v3 }
 0x736   :  { %3873 = vpow2.f32 %v2912_v45  ;;  %v1380_v45 = vld [vmem:[#allocation11 + $0x70] sm:$0xff] }
 0x73c   :  { %v3872_v49 = vpop.eup %3871 }
 0x73d   :  { %v1310_v16 = vadd.f32 1.0, %v3872_v49  ;;  %v4613_v17 = vpop.f32.mrb[16].mxu1  ;;  %v1383_v49 = vld [vmem:[#allocation11 + $0x88] sm:$0xff] }
 0x73e   :  { %v4615_v18 = vpop.f32.mrb[17].mxu1 }
 0x73f   :  { %3875 = vrcp.f32 %v1310_v16  ;;  %v4661_v16 = vpack.c.bf16 %v1381_v56, %v1378_v54  ;;  %v1410_v56 = vld [vmem:[#allocation11 + $0x160] sm:$0xff] }
 0x740   :  { %v3874_v36 = vpop.eup %3873 }
 0x741   :  { %v1311_v20 = vadd.f32 1.0, %v3874_v36  ;;  %v4665_v36 = vpack.c.bf16 %v1388_v44, %v1385_v63  ;;  %v1413_v63 = vld [vmem:[#allocation11 + $0x178] sm:$0xff] }
 0x742   :  { %v4718_v44 = vpack.c.bf16 %v1413_v63, %v1410_v56 }
 0x743   :  { %3877 = vrcp.f32 %v1311_v20  ;;  %v1384_v20 = vld [vmem:[#allocation11 + $0x90] sm:$0xff] }
 0x749   :  { %v3876_v61 = vpop.eup %3875 }
 0x74a   :  { %v1318_v50 = vmul.f32 %v3876_v61, %v1316_v19  ;;  %v1324_v47 = vsub.f32 1.0, %v3876_v61  ;;  %v1336_v53 = vmul.f32 %v3876_v61, %v4569_v62  ;;  %v1369_v62 = vld [vmem:[#allocation11 + $0x18] sm:$0xff]  ;;  %v1387_v19 = vld [vmem:[#allocation11 + $0xa8] sm:$0xff] }
 0x74b   :  { %v4643_v51 = vpack.c.bf16 %v1369_v62, %v1366_v6  ;;  %v1391_v61 = vld [vmem:[#allocation11 + $0xc8] sm:$0xff]  ;;  %v1402_v6 = vld [vmem:[#allocation11 + $0x120] sm:$0xff]  ;;  %v1405_v62 = vld [vmem:[#allocation11 + $0x138] sm:$0xff] }
 0x74c   :  { %v1320_v28 = vadd.f32 %v1318_v50, %v739_v42  ;;  %v4668_v42 = vpack.c.bf16 %v1383_v49, %v1380_v45  ;;  %v1394_v50 = vld [vmem:[#allocation11 + $0xe0] sm:$0xff] }
 0x74d   :  { %v3878_v22 = vpop.eup %3877  ;;  %v4621_v30 = vpop.f32.mrb[18].mxu1 }
 0x74e   :  { %3879 = vtanh.f32 %v1320_v28  ;;  %v1319_v52 = vmul.f32 %v3878_v22, %v1317_v21  ;;  %v4625_v25 = vpop.f32.mrb[19].mxu1  ;;  %v1325_v31 = vsub.f32 1.0, %v3878_v22  ;;  %v1337_v32 = vmul.f32 %v3878_v22, %v4574_v48  ;;  %v1372_v48 = vld [vmem:[#allocation11 + $0x30] sm:$0xff]  ;;  %v1386_v28 = vld [vmem:[#allocation11 + $0xa0] sm:$0xff]  ;;  %v1389_v21 = vld [vmem:[#allocation11 + $0xb8] sm:$0xff] }
 0x74f   :  { %v4651_v60 = vpack.c.bf16 %v1375_v35, %v1372_v48  ;;  %v4673_v22 = vpack.c.bf16 %v1387_v19, %v1384_v20  ;;  %v4680_v33 = vpack.c.bf16 %v1389_v21, %v1386_v28  ;;  %v1412_v48 = vld [vmem:[#allocation11 + $0x170] sm:$0xff]  ;;  %v1364_v20 = vld [vmem:[%s4936_s7] sm:$0x7] }
 0x750   :  { %v1321_v26 = vadd.f32 %v1319_v52, %v745_v23  ;;  %v4677_v23 = vpack.c.bf16 %v1394_v50, %v1391_v61  ;;  %v1390_v52 = vld [vmem:[#allocation11 + $0xc0] sm:$0xff]  ;;  %v1404_v35 = vld [vmem:[#allocation11 + $0x130] sm:$0xff]  ;;  %v4707_v11 = vpack.c.bf16 %v1412_v48, %v1409_v7  ;;  %v4772_v19 = vrot.slane %v1364_v20, %v151_v59 }
 0x751   :  { %v4710_v54 = vpack.c.bf16 %v1407_v9, %v1404_v35  ;;  %v4776_v50 = vrot.slane %v1364_v20, %v155_v13  ;;  %v4786_v48 = vld [vmem:[%s4937_s8] ss:$0 sm:$0xff]  ;;  %s4141_s8 = smov [#allocation13]  }
 0x752   :  { %3881 = vtanh.f32 %v1321_v26  ;;  %v1393_v26 = vld [vmem:[#allocation11 + $0xd8] sm:$0xff]  ;;  %s2851_s28 = sshll.u32 %s4141_s8, 4  ;;  %s2852_s28 = int_to_ptr.vmem [resolvable:$true] %s2851_s28 }
 0x753   :  { %s4095_s12 = scalar_lea.vmem %s2852_s28, 1024  ;;  %p4100_p7 = scmp.lt.s32.totalorder %s2852_s28, %s2852_s28 }
 0x754   :  { %p4096_p6 = scmp.ne.s32.totalorder %s2852_s28, %s4095_s12  ;;  %p4101_p8 = scmp.lt.s32.totalorder %s4095_s12, %s4095_s12 }
 0x756   :  { %p4102_p9 = por %p4101_p8, %p4100_p7 }
 0x758   :  { %v3880_v41 = vpop.eup %3879  ;;  %p4103_p10 = pnand %p4102_p9, %p4096_p6 }
 0x759   :  { %1328 = vrot.lane.b32.xlu0 %v3880_v41, %s4140_s4  ;;  %v1400_v41 = vld [vmem:[#allocation11 + $0x110] sm:$0xff] }
 0x75c   :  { %v3882_v14 = vpop.eup %3881 }
 0x75d   :  { %v4631_v40 = vpop.f32.mrb[20].mxu1  ;;  %1330 = vrot.lane.b32.xlu1 %v3882_v14, %s4140_s4  ;;  %v1392_v14 = vld [vmem:[#allocation11 + $0xd0] sm:$0xff] }
 0x75e   :  { %v4634_v15 = vpop.f32.mrb[21].mxu1 }
 0x7cb   :  { %v1329_v43 = vpop.permute.xlu0 %1328 }
 0x7cc   :  { %v1334_v29 = vmul.f32 %v1329_v43, %v1324_v47  ;;  %v1395_v47 = vld [vmem:[#allocation11 + $0xe8] sm:$0xff]  ;;  %v4683_v43 = vpack.c.bf16 %v1393_v26, %v1390_v52 }
 0x7ce   :  { %v1338_v55 = vadd.f32 %v1336_v53, %v1334_v29  ;;  %v4687_v53 = vpack.c.bf16 %v1400_v41, %v1397_v27  ;;  %v1396_v29 = vld [vmem:[#allocation11 + $0xf0] sm:$0xff] }
 0x7cf   :  { %v1331_v34 = vpop.permute.xlu1 %1330 }
 0x7d0   :  { %v1335_v38 = vmul.f32 %v1331_v34, %v1325_v31  ;;  %1888 = vrot.lane.b32.xlu0 %v1338_v55, %s4140_s4  ;;  %v1399_v55 = vld [vmem:[#allocation11 + $0x108] sm:$0xff]  ;;  %v4690_v34 = vpack.c.bf16 %v1395_v47, %v1392_v14 }
 0x7d1   :  { %v1403_v31 = vld [vmem:[#allocation11 + $0x128] sm:$0xff]  ;;  %v4693_v39 = vpack.c.bf16 %v1399_v55, %v1396_v29 }
 0x7d2   :  { %v1339_v2 = vadd.f32 %v1337_v32, %v1335_v38  ;;  %v1406_v32 = vld [vmem:[#allocation11 + $0x140] sm:$0xff] }
 0x7d3   :  { %v1398_v38 = vld [vmem:[#allocation11 + $0x100] sm:$0xff]  ;;  %v4697_v4 = vpack.c.bf16 %v1406_v32, %v1403_v31 }
 0x7d4   :  { %1890 = vrot.lane.b32.xlu1 %v1339_v2, %s4140_s4  ;;  %v1401_v2 = vld [vmem:[#allocation11 + $0x118] sm:$0xff] }
 0x7d5   :  { %v4700_v24 = vpack.c.bf16 %v1401_v2, %v1398_v38 }
 0x842   :  { %v1889_v10 = vpop.permute.xlu0 %1888 }
 0x843   :  { %2925 = vmatmul.mubr.msk.f32.vlgmr.msra.gmra.mrb[28].mxu0 %vm846_vm2, %v1889_v10  ;;  %3131 = vmatprep.mubr.msk.f32.mxu1 %vm846_vm2, %v1889_v10  ;;  %v4703_v10 = vpack.c.bf16 %v1405_v62, %v1402_v6  ;;  %v1425_v62 = vsub.s32 2, %v4407_v57 }
 0x844   :  { %3501 = vmatpush1.bf16.msra.mxu0 %v4643_v51  ;;  %1966 = vmatprep.mubr.f32.mxu0 %v4139_v0 }
 0x845   :  { %3503 = vmatprep.subr.bf16.mxu0 %v4645_v8  ;;  %v4788_v9 = vrot.slane %v1364_v20, %v1425_v62 }
 0x846   :  { %v1891_v3 = vpop.permute.xlu1 %1890 }
 0x847   :  { %2926 = vmatmul.mubr.msk.f32.gmra.mrb[30].mxu0 %vm846_vm2, %v1891_v3  ;;  %3132 = vmatmul.mubr.msk.f32.vlgmr.msra.gmra.mrb[22].mxu1 %vm846_vm2, %v1891_v3  ;;  %v4713_v3 = vpack.c.bf16 %v1411_v58, %v1408_v12 }
 0x848   :  { %3505 = vmatpush1.bf16.msra.mxu0 %v4651_v60  ;;  %3533 = vmatpush3.bf16.msra.mxu1 %v4640_v5 }
 0x849   :  { %3507 = vmatprep.subr.bf16.mxu0 %v4654_v46  ;;  %3535 = vmatprep.subr.bf16.mxu1 %v4656_v1 }
 0x84a   :  { %2118 = vmatprep.mubr.f32.mxu0 %v4139_v0  ;;  %3166 = vmatprep.mubr.f32.mxu1 %v4139_v0 }
 0x84c   :  { %3509 = vmatpush1.bf16.msra.mxu0 %v4661_v16  ;;  %3537 = vmatpush3.bf16.msra.mxu1 %v4656_v1 }
 0x84d   :  { %3511 = vmatprep.subr.bf16.mxu0 %v4665_v36  ;;  %3539 = vmatprep.subr.bf16.mxu1 %v4668_v42 }
 0x850   :  { %3513 = vmatpush1.bf16.msra.mxu0 %v4673_v22  ;;  %3541 = vmatpush3.bf16.msra.mxu1 %v4668_v42 }
 0x851   :  { %3515 = vmatprep.subr.bf16.mxu0 %v4677_v23  ;;  %3543 = vmatprep.subr.bf16.mxu1 %v4680_v33 }
 0x854   :  { %3517 = vmatpush1.bf16.msra.mxu0 %v4683_v43  ;;  %3545 = vmatpush3.bf16.msra.mxu1 %v4680_v33 }
 0x855   :  { %3519 = vmatprep.subr.bf16.mxu0 %v4687_v53  ;;  %3547 = vmatprep.subr.bf16.mxu1 %v4690_v34 }
 0x858   :  { %3521 = vmatpush1.bf16.msra.mxu0 %v4693_v39  ;;  %3549 = vmatpush3.bf16.msra.mxu1 %v4690_v34 }
 0x859   :  { %3523 = vmatprep.subr.bf16.mxu0 %v4697_v4  ;;  %3551 = vmatprep.subr.bf16.mxu1 %v4700_v24 }
 0x85c   :  { %3525 = vmatpush1.bf16.msra.mxu0 %v4703_v10  ;;  %3553 = vmatpush3.bf16.msra.mxu1 %v4700_v24 }
 0x85d   :  { %3527 = vmatprep.subr.bf16.mxu0 %v4707_v11  ;;  %3555 = vmatprep.subr.bf16.mxu1 %v4710_v54 }
 0x860   :  { %3529 = vmatpush1.bf16.msra.mxu0 %v4713_v3  ;;  %3557 = vmatpush3.bf16.msra.mxu1 %v4710_v54 }
 0x861   :  { %3559 = vmatprep.subr.bf16.mxu1 %v4718_v44  ;;  %3563 = vmatprep.subr.bf16.mxu0 %v4627_v37 }
 0x863   :  { %2119 = vmatmul.mubr.f32.vlgmr.msra.gmra.mrb[16].mxu0 %v4139_v0 }
 0x864   :  { %2124 = vmatprep.mubr.f32.mxu0 %v4139_v0  ;;  %3561 = vmatpush3.bf16.msra.mxu1 %v4718_v44 }
 0x865   :  { %3565 = vmatpush1.bf16.msra.mxu0 %v4643_v51  ;;  %3595 = vmatprep.subr.bf16.mxu1 %v4640_v5 }
 0x866   :  { %3567 = vmatprep.subr.bf16.mxu0 %v4645_v8 }
 0x867   :  { %2125 = vmatmul.mubr.f32.gmra.mrb[18].mxu0 %v4139_v0  ;;  %3167 = vmatmul.mubr.f32.vlgmr.msra.gmra.mrb[24].mxu1 %v4139_v0 }
 0x868   :  { %3597 = vmatpush3.bf16.msra.mxu1 %v4640_v5  ;;  %2314 = vmatprep.mubr.f32.mxu0 %v4139_v0 }
 0x869   :  { %3569 = vmatpush1.bf16.msra.mxu0 %v4651_v60  ;;  %3599 = vmatprep.subr.bf16.mxu1 %v4656_v1 }
 0x86a   :  { %3571 = vmatprep.subr.bf16.mxu0 %v4654_v46 }
 0x86c   :  { %3601 = vmatpush3.bf16.msra.mxu1 %v4656_v1 }
 0x86d   :  { %3573 = vmatpush1.bf16.msra.mxu0 %v4661_v16  ;;  %3603 = vmatprep.subr.bf16.mxu1 %v4668_v42 }
 0x86e   :  { %3575 = vmatprep.subr.bf16.mxu0 %v4665_v36 }
 0x870   :  { %3605 = vmatpush3.bf16.msra.mxu1 %v4668_v42 }
 0x871   :  { %3577 = vmatpush1.bf16.msra.mxu0 %v4673_v22  ;;  %3607 = vmatprep.subr.bf16.mxu1 %v4680_v33 }
 0x872   :  { %3579 = vmatprep.subr.bf16.mxu0 %v4677_v23 }
 0x874   :  { %3609 = vmatpush3.bf16.msra.mxu1 %v4680_v33 }
 0x875   :  { %3581 = vmatpush1.bf16.msra.mxu0 %v4683_v43  ;;  %3611 = vmatprep.subr.bf16.mxu1 %v4690_v34 }
 0x876   :  { %3583 = vmatprep.subr.bf16.mxu0 %v4687_v53 }
 0x878   :  { %3613 = vmatpush3.bf16.msra.mxu1 %v4690_v34 }
 0x879   :  { %3585 = vmatpush1.bf16.msra.mxu0 %v4693_v39  ;;  %3615 = vmatprep.subr.bf16.mxu1 %v4700_v24 }
 0x87a   :  { %3587 = vmatprep.subr.bf16.mxu0 %v4697_v4 }
 0x87c   :  { %3617 = vmatpush3.bf16.msra.mxu1 %v4700_v24 }
 0x87d   :  { %3589 = vmatpush1.bf16.msra.mxu0 %v4703_v10  ;;  %3619 = vmatprep.subr.bf16.mxu1 %v4710_v54 }
 0x87e   :  { %3591 = vmatprep.subr.bf16.mxu0 %v4707_v11 }
 0x880   :  { %3621 = vmatpush3.bf16.msra.mxu1 %v4710_v54 }
 0x881   :  { %3593 = vmatpush1.bf16.msra.mxu0 %v4713_v3  ;;  %3623 = vmatprep.subr.bf16.mxu1 %v4718_v44 }
 0x882   :  { %3627 = vmatprep.subr.bf16.mxu0 %v4627_v37 }
 0x884   :  { %3625 = vmatpush3.bf16.msra.mxu1 %v4718_v44 }
 0x885   :  { %3659 = vmatprep.subr.bf16.mxu1 %v4640_v5 }
 0x91a   :  { %v4763_v45 = vpop.f32.mrb[22].mxu1 }
 0x91b   :  { %v4765_v49 = vpop.f32.mrb[23].mxu1 }
 0x936   :  { %v2120_v61 = vpop.f32.mrb[16].mxu0 }
 0x937   :  { %v3770_v28 = vadd.f32 %v2120_v61, %v4772_v19  ;;  %v2122_v21 = vpop.f32.mrb[17].mxu0  ;;  %v1574_v61 = vadd.f32 %v4615_v18, %v4788_v9 }
 0x938   :  { %v3771_v26 = vadd.f32 %v2122_v21, %v4776_v50 }
 0x939   :  { %v2930_v52 = vmul.f32 -1.442695, %v3770_v28 }
 0x93a   :  { %v2126_v27 = vpop.f32.mrb[18].mxu0  ;;  %v3168_v41 = vpop.f32.mrb[24].mxu1  ;;  %v2931_v31 = vmul.f32 -1.442695, %v3771_v26  ;;  %v1579_v26 = vadd.f32 %v4613_v17, %v4788_v9 }
 0x93b   :  { %3883 = vpow2.f32 %v2930_v52  ;;  %v3772_v14 = vadd.f32 %v2126_v27, %v4772_v19  ;;  %v2128_v47 = vpop.f32.mrb[19].mxu0  ;;  %v2197_v29 = vpop.f32.mrb[25].mxu1  ;;  %v2235_v28 = vadd.f32 %v3168_v41, %v4786_v48 }
 0x93c   :  { %v3773_v55 = vadd.f32 %v2128_v47, %v4776_v50  ;;  %v2234_v58 = vadd.f32 %v4786_v48, %v2197_v29 }
 0x93d   :  { %v2932_v59 = vmul.f32 -1.442695, %v3772_v14 }
 0x93e   :  { %v2933_v13 = vmul.f32 -1.442695, %v3773_v55 }
 0x93f   :  { %3885 = vpow2.f32 %v2932_v59 }
 0x940   :  { %3887 = vpow2.f32 %v2931_v31 }
 0x941   :  { %3889 = vpow2.f32 %v2933_v13 }
 0x945   :  { %v3884_v32 = vpop.eup %3883 }
 0x946   :  { %v2222_v38 = vadd.f32 1.0, %v3884_v32 }
 0x948   :  { %3891 = vrcp.f32 %v2222_v38 }
 0x949   :  { %v3886_v2 = vpop.eup %3885 }
 0x94a   :  { %v2224_v6 = vadd.f32 1.0, %v3886_v2  ;;  %v3888_v7 = vpop.eup %3887 }
 0x94b   :  { %v3890_v35 = vpop.eup %3889  ;;  %v2223_v12 = vadd.f32 1.0, %v3888_v7 }
 0x94c   :  { %3893 = vrcp.f32 %v2224_v6  ;;  %v2225_v63 = vadd.f32 1.0, %v3890_v35 }
 0x94d   :  { %3895 = vrcp.f32 %v2223_v12 }
 0x94e   :  { %3897 = vrcp.f32 %v2225_v63 }
 0x952   :  { %v3892_v56 = vpop.eup %3891 }
 0x953   :  { %v2236_v57 = vmul.f32 %v3892_v56, %v2234_v58 }
 0x955   :  { %v2238_v21 = vadd.f32 %v2236_v57, %v1574_v61 }
 0x956   :  { %v3894_v52 = vpop.eup %3893 }
 0x957   :  { %v2237_v20 = vmul.f32 %v3894_v52, %v2235_v28  ;;  %3899 = vtanh.f32 %v2238_v21  ;;  %v3896_v14 = vpop.eup %3895 }
 0x958   :  { %v3898_v47 = vpop.eup %3897  ;;  %v2242_v29 = vsub.f32 1.0, %v3896_v14  ;;  %v2246_v18 = vmul.f32 0.0, %v3896_v14 }
 0x959   :  { %v2239_v27 = vadd.f32 %v2237_v20, %v1579_v26  ;;  %v2243_v13 = vsub.f32 1.0, %v3898_v47  ;;  %v2247_v32 = vmul.f32 0.0, %v3898_v47 }
 0x95b   :  { %3901 = vtanh.f32 %v2239_v27 }
 0x961   :  { %v3900_v59 = vpop.eup %3899 }
 0x962   :  { %v2244_v55 = vmul.f32 %v3900_v59, %v2242_v29 }
 0x964   :  { %v4796_v31 = vadd.f32 %v2246_v18, %v2244_v55 }
 0x965   :  { %v3902_v41 = vpop.eup %3901 }
 0x966   :  { %2315 = vmatmul.mubr.f32.vlgmr.msra.gmra.mrb[20].mxu0 %v4796_v31  ;;  %2838 = vst [vmem:[#allocation13] sm:$0xff] %v4796_v31  ;;  %3201 = vmatprep.mubr.f32.mxu1 %v4796_v31  ;;  %v2245_v17 = vmul.f32 %v3902_v41, %v2243_v13  ;;  %v1726_v13 = vadd.f32 %v4625_v25, %v4788_v9 }
 0x967   :  { %2320 = vmatprep.mubr.f32.mxu0 %v4139_v0  ;;  %3629 = vmatpush1.bf16.msra.mxu0 %v4643_v51 }
 0x968   :  { %v4803_v38 = vadd.f32 %v2247_v32, %v2245_v17  ;;  %3631 = vmatprep.subr.bf16.mxu0 %v4645_v8 }
 0x96a   :  { %2321 = vmatmul.mubr.f32.gmra.mrb[22].mxu0 %v4803_v38  ;;  %2842 = vst [vmem:[#allocation13 + $0x20] sm:$0xff] %v4803_v38  ;;  %3202 = vmatmul.mubr.f32.vlgmr.msra.gmra.mrb[26].mxu1 %v4803_v38 }
 0x96b   :  { %3633 = vmatpush1.bf16.msra.mxu0 %v4651_v60  ;;  %3661 = vmatpush3.bf16.msra.mxu1 %v4640_v5 }
 0x96c   :  { %3635 = vmatprep.subr.bf16.mxu0 %v4654_v46  ;;  %3663 = vmatprep.subr.bf16.mxu1 %v4656_v1 }
 0x96d   :  { %2510 = vmatprep.mubr.f32.mxu0 %v4139_v0 }
 0x96f   :  { %3637 = vmatpush1.bf16.msra.mxu0 %v4661_v16  ;;  %3665 = vmatpush3.bf16.msra.mxu1 %v4656_v1 }
 0x970   :  { %3639 = vmatprep.subr.bf16.mxu0 %v4665_v36  ;;  %3667 = vmatprep.subr.bf16.mxu1 %v4668_v42 }
 0x973   :  { %3641 = vmatpush1.bf16.msra.mxu0 %v4673_v22  ;;  %3669 = vmatpush3.bf16.msra.mxu1 %v4668_v42 }
 0x974   :  { %3643 = vmatprep.subr.bf16.mxu0 %v4677_v23  ;;  %3671 = vmatprep.subr.bf16.mxu1 %v4680_v33 }
 0x977   :  { %3645 = vmatpush1.bf16.msra.mxu0 %v4683_v43  ;;  %3673 = vmatpush3.bf16.msra.mxu1 %v4680_v33 }
 0x978   :  { %3647 = vmatprep.subr.bf16.mxu0 %v4687_v53  ;;  %3675 = vmatprep.subr.bf16.mxu1 %v4690_v34 }
 0x97b   :  { %3649 = vmatpush1.bf16.msra.mxu0 %v4693_v39  ;;  %3677 = vmatpush3.bf16.msra.mxu1 %v4690_v34 }
 0x97c   :  { %3651 = vmatprep.subr.bf16.mxu0 %v4697_v4  ;;  %3679 = vmatprep.subr.bf16.mxu1 %v4700_v24 }
 0x97f   :  { %3653 = vmatpush1.bf16.msra.mxu0 %v4703_v10  ;;  %3681 = vmatpush3.bf16.msra.mxu1 %v4700_v24 }
 0x980   :  { %3655 = vmatprep.subr.bf16.mxu0 %v4707_v11  ;;  %3683 = vmatprep.subr.bf16.mxu1 %v4710_v54 }
 0x983   :  { %3657 = vmatpush1.bf16.msra.mxu0 %v4713_v3  ;;  %3685 = vmatpush3.bf16.msra.mxu1 %v4710_v54 }
 0x984   :  { %3687 = vmatprep.subr.bf16.mxu1 %v4718_v44  ;;  %3691 = vmatprep.subr.bf16.mxu0 %v4627_v37 }
 0x987   :  { %3689 = vmatpush3.bf16.msra.mxu1 %v4718_v44 }
 0x988   :  { %3723 = vmatprep.subr.bf16.mxu1 %v4640_v5 }
 0xa39   :  { %v2316_v2 = vpop.f32.mrb[20].mxu0 }
 0xa3a   :  { %v3774_v6 = vadd.f32 %v2316_v2, %v4772_v19  ;;  %v2318_v62 = vpop.f32.mrb[21].mxu0 }
 0xa3b   :  { %v3775_v35 = vadd.f32 %v2318_v62, %v4776_v50 }
 0xa3c   :  { %v2934_v7 = vmul.f32 -1.442695, %v3774_v6  ;;  %v1731_v6 = vadd.f32 %v4621_v30, %v4788_v9 }
 0xa3d   :  { %v2322_v12 = vpop.f32.mrb[22].mxu0  ;;  %v3203_v58 = vpop.f32.mrb[26].mxu1  ;;  %v2935_v28 = vmul.f32 -1.442695, %v3775_v35 }
 0xa3e   :  { %3903 = vpow2.f32 %v2934_v7  ;;  %v3776_v56 = vadd.f32 %v2322_v12, %v4772_v19  ;;  %v2324_v63 = vpop.f32.mrb[23].mxu0  ;;  %v2393_v61 = vpop.f32.mrb[27].mxu1  ;;  %v2431_v17 = vadd.f32 %v3203_v58, %v4786_v48 }
 0xa3f   :  { %v3777_v37 = vadd.f32 %v2324_v63, %v4776_v50  ;;  %v2430_v59 = vadd.f32 %v4786_v48, %v2393_v61 }
 0xa40   :  { %v2936_v57 = vmul.f32 -1.442695, %v3776_v56 }
 0xa41   :  { %v2937_v21 = vmul.f32 -1.442695, %v3777_v37 }
 0xa42   :  { %3905 = vpow2.f32 %v2936_v57 }
 0xa43   :  { %3907 = vpow2.f32 %v2935_v28 }
 0xa44   :  { %3909 = vpow2.f32 %v2937_v21 }
 0xa48   :  { %v3904_v52 = vpop.eup %3903 }
 0xa49   :  { %v2418_v26 = vadd.f32 1.0, %v3904_v52 }
 0xa4b   :  { %3911 = vrcp.f32 %v2418_v26 }
 0xa4c   :  { %v3906_v20 = vpop.eup %3905 }
 0xa4d   :  { %v2420_v27 = vadd.f32 1.0, %v3906_v20  ;;  %v3908_v14 = vpop.eup %3907 }
 0xa4e   :  { %v3910_v47 = vpop.eup %3909  ;;  %v2419_v29 = vadd.f32 1.0, %v3908_v14  ;;  %v1883_v14 = vadd.f32 %v4631_v40, %v4788_v9 }
 0xa4f   :  { %3913 = vrcp.f32 %v2420_v27  ;;  %v2421_v18 = vadd.f32 1.0, %v3910_v47 }
 0xa50   :  { %3915 = vrcp.f32 %v2419_v29 }
 0xa51   :  { %3917 = vrcp.f32 %v2421_v18 }
 0xa55   :  { %v3912_v55 = vpop.eup %3911 }
 0xa56   :  { %v2432_v41 = vmul.f32 %v3912_v55, %v2430_v59 }
 0xa58   :  { %v2434_v32 = vadd.f32 %v2432_v41, %v1726_v13 }
 0xa59   :  { %v3914_v2 = vpop.eup %3913 }
 0xa5a   :  { %v2433_v62 = vmul.f32 %v3914_v2, %v2431_v17  ;;  %3919 = vtanh.f32 %v2434_v32  ;;  %v3916_v35 = vpop.eup %3915 }
 0xa5b   :  { %v3918_v12 = vpop.eup %3917  ;;  %v2438_v56 = vsub.f32 1.0, %v3916_v35  ;;  %v2442_v25 = vmul.f32 %v3916_v35, %v4796_v31 }
 0xa5c   :  { %v2435_v7 = vadd.f32 %v2433_v62, %v1731_v6  ;;  %v2439_v58 = vsub.f32 1.0, %v3918_v12  ;;  %v2443_v28 = vmul.f32 %v3918_v12, %v4803_v38  ;;  %v1878_v38 = vadd.f32 %v4634_v15, %v4788_v9 }
 0xa5e   :  { %3921 = vtanh.f32 %v2435_v7 }
 0xa64   :  { %v3920_v63 = vpop.eup %3919 }
 0xa65   :  { %v2440_v61 = vmul.f32 %v3920_v63, %v2438_v56 }
 0xa67   :  { %v4851_v57 = vadd.f32 %v2442_v25, %v2440_v61 }
 0xa68   :  { %v3922_v37 = vpop.eup %3921 }
 0xa69   :  { %2511 = vmatmul.mubr.f32.vlgmr.msra.gmra.mrb[24].mxu0 %v4851_v57  ;;  %2839 = vst [vmem:[#allocation13 + $0x8] sm:$0xff] %v4851_v57  ;;  %3236 = vmatprep.mubr.f32.mxu1 %v4851_v57  ;;  %v2441_v30 = vmul.f32 %v3922_v37, %v2439_v58 }
 0xa6a   :  { %2516 = vmatprep.mubr.f32.mxu0 %v4139_v0  ;;  %3693 = vmatpush1.bf16.msra.mxu0 %v4643_v51 }
 0xa6b   :  { %v4859_v21 = vadd.f32 %v2443_v28, %v2441_v30  ;;  %3695 = vmatprep.subr.bf16.mxu0 %v4645_v8 }
 0xa6d   :  { %2517 = vmatmul.mubr.f32.gmra.mrb[26].mxu0 %v4859_v21  ;;  %2843 = vst [vmem:[#allocation13 + $0x28] sm:$0xff] %v4859_v21  ;;  %3237 = vmatmul.mubr.f32.vlgmr.msra.gmra.mrb[28].mxu1 %v4859_v21 }
 0xa6e   :  { %3697 = vmatpush1.bf16.msra.mxu0 %v4651_v60  ;;  %3725 = vmatpush3.bf16.msra.mxu1 %v4640_v5 }
 0xa6f   :  { %3699 = vmatprep.subr.bf16.mxu0 %v4654_v46  ;;  %3727 = vmatprep.subr.bf16.mxu1 %v4656_v1 }
 0xa70   :  { %2706 = vmatprep.mubr.f32.mxu0 %v4139_v0 }
 0xa72   :  { %3701 = vmatpush1.bf16.msra.mxu0 %v4661_v16  ;;  %3729 = vmatpush3.bf16.msra.mxu1 %v4656_v1 }
 0xa73   :  { %3703 = vmatprep.subr.bf16.mxu0 %v4665_v36  ;;  %3731 = vmatprep.subr.bf16.mxu1 %v4668_v42 }
 0xa76   :  { %3705 = vmatpush1.bf16.msra.mxu0 %v4673_v22  ;;  %3733 = vmatpush3.bf16.msra.mxu1 %v4668_v42 }
 0xa77   :  { %3707 = vmatprep.subr.bf16.mxu0 %v4677_v23  ;;  %3735 = vmatprep.subr.bf16.mxu1 %v4680_v33 }
 0xa7a   :  { %3709 = vmatpush1.bf16.msra.mxu0 %v4683_v43  ;;  %3737 = vmatpush3.bf16.msra.mxu1 %v4680_v33 }
 0xa7b   :  { %3711 = vmatprep.subr.bf16.mxu0 %v4687_v53  ;;  %3739 = vmatprep.subr.bf16.mxu1 %v4690_v34 }
 0xa7e   :  { %3713 = vmatpush1.bf16.msra.mxu0 %v4693_v39  ;;  %3741 = vmatpush3.bf16.msra.mxu1 %v4690_v34 }
 0xa7f   :  { %3715 = vmatprep.subr.bf16.mxu0 %v4697_v4  ;;  %3743 = vmatprep.subr.bf16.mxu1 %v4700_v24 }
 0xa82   :  { %3717 = vmatpush1.bf16.msra.mxu0 %v4703_v10  ;;  %3745 = vmatpush3.bf16.msra.mxu1 %v4700_v24 }
 0xa83   :  { %3719 = vmatprep.subr.bf16.mxu0 %v4707_v11  ;;  %3747 = vmatprep.subr.bf16.mxu1 %v4710_v54 }
 0xa86   :  { %3721 = vmatpush1.bf16.msra.mxu0 %v4713_v3  ;;  %3749 = vmatpush3.bf16.msra.mxu1 %v4710_v54 }
 0xa87   :  { %3751 = vmatprep.subr.bf16.mxu1 %v4718_v44 }
 0xa8a   :  { %3753 = vmatpush3.bf16.msra.mxu1 %v4718_v44 }
 0xb3c   :  { %v2512_v5 = vpop.f32.mrb[24].mxu0 }
 0xb3d   :  { %v3778_v51 = vadd.f32 %v2512_v5, %v4772_v19  ;;  %v2514_v8 = vpop.f32.mrb[25].mxu0 }
 0xb3e   :  { %v3779_v46 = vadd.f32 %v2514_v8, %v4776_v50 }
 0xb3f   :  { %v2938_v60 = vmul.f32 -1.442695, %v3778_v51 }
 0xb40   :  { %v2518_v1 = vpop.f32.mrb[26].mxu0  ;;  %v3238_v16 = vpop.f32.mrb[28].mxu1  ;;  %v2939_v43 = vmul.f32 -1.442695, %v3779_v46 }
 0xb41   :  { %3923 = vpow2.f32 %v2938_v60  ;;  %v3780_v36 = vadd.f32 %v2518_v1, %v4772_v19  ;;  %v2520_v42 = vpop.f32.mrb[27].mxu0  ;;  %v2589_v22 = vpop.f32.mrb[29].mxu1  ;;  %v2627_v26 = vadd.f32 %v3238_v16, %v4786_v48 }
 0xb42   :  { %v3781_v33 = vadd.f32 %v2520_v42, %v4776_v50  ;;  %v2626_v3 = vadd.f32 %v4786_v48, %v2589_v22 }
 0xb43   :  { %v2940_v23 = vmul.f32 -1.442695, %v3780_v36 }
 0xb44   :  { %v2941_v53 = vmul.f32 -1.442695, %v3781_v33 }
 0xb45   :  { %3925 = vpow2.f32 %v2940_v23 }
 0xb46   :  { %3927 = vpow2.f32 %v2939_v43 }
 0xb47   :  { %3929 = vpow2.f32 %v2941_v53  ;;  %v2045_v53 = vadd.f32 %v4763_v45, %v4788_v9 }
 0xb4b   :  { %v3924_v34 = vpop.eup %3923 }
 0xb4c   :  { %v2614_v39 = vadd.f32 1.0, %v3924_v34 }
 0xb4e   :  { %3931 = vrcp.f32 %v2614_v39 }
 0xb4f   :  { %v3926_v4 = vpop.eup %3925 }
 0xb50   :  { %v2616_v24 = vadd.f32 1.0, %v3926_v4  ;;  %v3928_v10 = vpop.eup %3927 }
 0xb51   :  { %v3930_v11 = vpop.eup %3929  ;;  %v2615_v54 = vadd.f32 1.0, %v3928_v10 }
 0xb52   :  { %3933 = vrcp.f32 %v2616_v24  ;;  %v2617_v31 = vadd.f32 1.0, %v3930_v11 }
 0xb53   :  { %3935 = vrcp.f32 %v2615_v54 }
 0xb54   :  { %3937 = vrcp.f32 %v2617_v31 }
 0xb58   :  { %v3932_v44 = vpop.eup %3931 }
 0xb59   :  { %v2628_v52 = vmul.f32 %v3932_v44, %v2626_v3 }
 0xb5b   :  { %v2630_v20 = vadd.f32 %v2628_v52, %v1878_v38 }
 0xb5c   :  { %v3934_v27 = vpop.eup %3933 }
 0xb5d   :  { %v2629_v47 = vmul.f32 %v3934_v27, %v2627_v26  ;;  %3939 = vtanh.f32 %v2630_v20  ;;  %v3936_v59 = vpop.eup %3935 }
 0xb5e   :  { %v3938_v55 = vpop.eup %3937  ;;  %v2634_v18 = vsub.f32 1.0, %v3936_v59  ;;  %v2638_v15 = vmul.f32 %v3936_v59, %v4851_v57 }
 0xb5f   :  { %v2631_v29 = vadd.f32 %v2629_v47, %v1883_v14  ;;  %v2635_v32 = vsub.f32 1.0, %v3938_v55  ;;  %v2639_v40 = vmul.f32 %v3938_v55, %v4859_v21 }
 0xb61   :  { %3941 = vtanh.f32 %v2631_v29 }
 0xb67   :  { %v3940_v13 = vpop.eup %3939 }
 0xb68   :  { %v2636_v41 = vmul.f32 %v3940_v13, %v2634_v18 }
 0xb6a   :  { %v2640_v17 = vadd.f32 %v2638_v15, %v2636_v41 }
 0xb6b   :  { %v3942_v2 = vpop.eup %3941 }
 0xb6c   :  { %2707 = vmatmul.mubr.f32.vlgmr.msra.gmra.mrb[28].mxu0 %v2640_v17  ;;  %2840 = vst [vmem:[#allocation13 + $0x10] sm:$0xff] %v2640_v17  ;;  %3271 = vmatprep.mubr.f32.mxu1 %v2640_v17  ;;  %v2637_v6 = vmul.f32 %v3942_v2, %v2635_v32 }
 0xb6d   :  { %2712 = vmatprep.mubr.f32.mxu0 %v4139_v0 }
 0xb6e   :  { %v2641_v62 = vadd.f32 %v2639_v40, %v2637_v6 }
 0xb70   :  { %2713 = vmatmul.mubr.f32.gmra.mrb[30].mxu0 %v2641_v62  ;;  %2844 = vst [vmem:[#allocation13 + $0x30] sm:$0xff] %v2641_v62  ;;  %3272 = vmatmul.mubr.f32.vlgmr.msra.gmra.mrb[30].mxu1 %v2641_v62 }
 0xc3f   :  { %v2708_v7 = vpop.f32.mrb[28].mxu0 }
 0xc40   :  { %v3782_v35 = vadd.f32 %v2708_v7, %v4772_v19  ;;  %v2710_v12 = vpop.f32.mrb[29].mxu0 }
 0xc41   :  { %v3783_v63 = vadd.f32 %v2710_v12, %v4776_v50 }
 0xc42   :  { %v2942_v56 = vmul.f32 -1.442695, %v3782_v35 }
 0xc43   :  { %v2714_v61 = vpop.f32.mrb[30].mxu0  ;;  %v3273_v25 = vpop.f32.mrb[30].mxu1  ;;  %v2943_v28 = vmul.f32 -1.442695, %v3783_v63 }
 0xc44   :  { %3943 = vpow2.f32 %v2942_v56  ;;  %v3784_v57 = vadd.f32 %v2714_v61, %v4772_v19  ;;  %v2716_v58 = vpop.f32.mrb[31].mxu0  ;;  %v2785_v37 = vpop.f32.mrb[31].mxu1  ;;  %v2823_v23 = vadd.f32 %v3273_v25, %v4786_v48 }
 0xc45   :  { %v3785_v0 = vadd.f32 %v2716_v58, %v4776_v50  ;;  %v2822_v19 = vadd.f32 %v4786_v48, %v2785_v37  ;;  %v2040_v50 = vadd.f32 %v4765_v49, %v4788_v9 }
 0xc46   :  { %v2944_v30 = vmul.f32 -1.442695, %v3784_v57 }
 0xc47   :  { %v2945_v21 = vmul.f32 -1.442695, %v3785_v0 }
 0xc48   :  { %3945 = vpow2.f32 %v2944_v30 }
 0xc49   :  { %3947 = vpow2.f32 %v2943_v28 }
 0xc4a   :  { %3949 = vpow2.f32 %v2945_v21 }
 0xc4e   :  { %v3944_v5 = vpop.eup %3943 }
 0xc4f   :  { %v2810_v51 = vadd.f32 1.0, %v3944_v5 }
 0xc51   :  { %3951 = vrcp.f32 %v2810_v51 }
 0xc52   :  { %v3946_v8 = vpop.eup %3945 }
 0xc53   :  { %v2812_v60 = vadd.f32 1.0, %v3946_v8  ;;  %v3948_v46 = vpop.eup %3947 }
 0xc54   :  { %v3950_v1 = vpop.eup %3949  ;;  %v2811_v16 = vadd.f32 1.0, %v3948_v46 }
 0xc55   :  { %3953 = vrcp.f32 %v2812_v60  ;;  %v2813_v42 = vadd.f32 1.0, %v3950_v1 }
 0xc56   :  { %3955 = vrcp.f32 %v2811_v16 }
 0xc57   :  { %3957 = vrcp.f32 %v2813_v42 }
 0xc5b   :  { %v3952_v36 = vpop.eup %3951 }
 0xc5c   :  { %v2824_v22 = vmul.f32 %v3952_v36, %v2822_v19 }
 0xc5e   :  { %v2826_v33 = vadd.f32 %v2824_v22, %v2040_v50 }
 0xc5f   :  { %v3954_v43 = vpop.eup %3953 }
 0xc60   :  { %v2825_v34 = vmul.f32 %v3954_v43, %v2823_v23  ;;  %3959 = vtanh.f32 %v2826_v33  ;;  %v3956_v4 = vpop.eup %3955 }
 0xc61   :  { %v3958_v24 = vpop.eup %3957  ;;  %v2830_v10 = vsub.f32 1.0, %v3956_v4  ;;  %v2834_v54 = vmul.f32 %v3956_v4, %v2640_v17 }
 0xc62   :  { %v2827_v39 = vadd.f32 %v2825_v34, %v2045_v53  ;;  %v2831_v3 = vsub.f32 1.0, %v3958_v24  ;;  %v2835_v38 = vmul.f32 %v3958_v24, %v2641_v62 }
 0xc64   :  { %3961 = vtanh.f32 %v2827_v39 }
 0xc6a   :  { %v3960_v11 = vpop.eup %3959 }
 0xc6b   :  { %v2832_v49 = vmul.f32 %v3960_v11, %v2830_v10 }
 0xc6d   :  { %v2836_v44 = vadd.f32 %v2834_v54, %v2832_v49 }
 0xc6e   :  { %v3962_v48 = vpop.eup %3961 }
 0xc6f   :  { %v2833_v31 = vmul.f32 %v3962_v48, %v2831_v3  ;;  %2841 = vst [vmem:[#allocation13 + $0x18] sm:$0xff] %v2836_v44 }
 0xc71   :  { %v2837_v45 = vadd.f32 %v2835_v38, %v2833_v31 }
 0xc73   :  { %2845 = vst [vmem:[#allocation13 + $0x38] sm:$0xff] %v2837_v45 }
 0xc74   :  { %4106 = shalt.err (!%p4103_p10)
}
 0xc75   :  { %s4107_s2 = scalar_lea.hbm %s4939_s10, 1024 }
 0xc76   :  { %p4108_p11 = scmp.ne.s32.totalorder %s4939_s10, %s4107_s2  ;;  %p4111_p12 = scmp.lt.u32.totalorder %s4107_s2, %s4939_s10 }
 0xc78   :  { %p4113_p13 = pnand %p4111_p12, %p4108_p11 }
 0xc7a   :  { %4116 = shalt.err (!%p4113_p13)
}
 0xc7b   :  { %s4142_s1 = smov 512   ;;  %s4143_s14 = smov 32  }
 0xc7c   :  { %2857 = dma.vmem_to_hbm [thread:$0]  %s2852_s28, 1024, %s4939_s10, [#allocation4], %s4142_s1, %s4142_s1, %s4143_s14  }
 0xc7d   :  { %4125 = dma.done.wait [#allocation4], 1024  }
 0xc7e   :  { %4126 = vsyncadd [#allocation4], 4294966272 }
 0xc7f   :  { %2861 = vsyncpa [#allocation3], 1 }
 0xc80   :  { %2862 = vsyncpa [#allocation6], 1 }
 0xc81   :  { %2863 = vsyncpa [#allocation9], 1 }
 0xc82   :  { %2864 = vsyncpa [#allocation12], 1 }
 0xc83   :  { %2865 = vsyncpa [#allocation4], 1 }

</bundles_post_ra>
